<compile_context>
chip_gen: v7x
topology: tpu7x:2x2x1
jax: 0.10.0
libtpu: 0.0.40
codegen_flags: <defaults>
</compile_context>

<pallas_src>
import math

import jax
import jax.numpy as jnp
from jax import lax
from jax.experimental import pallas as pl
from jax.experimental.pallas import tpu as pltpu

WINDOW_SIZE = 11
SIGMA = 1.5
C1 = 0.01 ** 2
C2 = 0.03 ** 2


def _gaussian_1d(window_size=WINDOW_SIZE, sigma=SIGMA):
    # Deterministic re-implementation of gaussian() from the PyTorch module.
    g = [math.exp(-((x - window_size // 2) ** 2) / (2.0 * sigma ** 2))
         for x in range(window_size)]
    s = sum(g)
    return [v / s for v in g]


def _round_up(x, m):
    return (x + m - 1) // m * m


def _make_ssim_kernel(H, W, Hp_a, Wp_a, S, L, B, window_size):
    assert window_size % 2 == 1
    g = _gaussian_1d(window_size)
    half = window_size // 2          # center tap
    last = window_size - 1           # mirror partner of tap 0

    def shift_lanes(v, dx):
        # v[:, c] <- v[:, (c + dx) % Wp_a]; wraparound only touches lanes that
        # the validity mask removes (valid lanes never read past L*S - 1).
        if dx == 0:
            return v
        return pltpu.roll(v, Wp_a - dx, axis=1)

    def kernel(img1_ref, img2_ref, out_ref, stage_ref):
        row_iota = lax.broadcasted_iota(jnp.int32, (8, Wp_a), 0)
        lane_iota = lax.broadcasted_iota(jnp.int32, (1, Wp_a), 1)
        valid = None
        for l in range(L):           # valid output lanes of packed plane l
            m_l = (lane_iota >= l * S) & (lane_iota < l * S + W)
            valid = m_l if valid is None else (valid | m_l)

        def gconv(idx):
            # Vertical pass: static-row-offset VMEM loads, symmetric pairing.
            v = g[half] * stage_ref[idx, half:half + H, :]
            for d in range(half):
                v = v + g[d] * (stage_ref[idx, d:d + H, :]
                                + stage_ref[idx, last - d:last - d + H, :])
            # Horizontal pass: XLU lane rotations, symmetric pairing.
            m = g[half] * shift_lanes(v, half)
            for d in range(half):
                m = m + g[d] * (shift_lanes(v, d) + shift_lanes(v, last - d))
            return m

        def body(s, acc):
            x1 = img1_ref[s]
            x2 = img2_ref[s]
            # Stage the 5 conv inputs so every vertical tap is a plain
            # static-offset load (no in-vreg sublane shuffles or copies).
            stage_ref[0] = x1
            stage_ref[1] = x2
            stage_ref[2] = x1 * x1
            stage_ref[3] = x2 * x2
            stage_ref[4] = x1 * x2

            mu1 = gconv(0)
            mu2 = gconv(1)
            e11 = gconv(2)
            e22 = gconv(3)
            e12 = gconv(4)

            mu1_sq = mu1 * mu1
            mu2_sq = mu2 * mu2
            mu1_mu2 = mu1 * mu2
            sigma1_sq = e11 - mu1_sq
            sigma2_sq = e22 - mu2_sq
            sigma12 = e12 - mu1_mu2

            num = (2.0 * mu1_mu2 + C1) * (2.0 * sigma12 + C2)
            den = (mu1_sq + mu2_sq + C1) * (sigma1_sq + sigma2_sq + C2)
            # EUP approximate reciprocal + one Newton step (f32 accurate).
            inv = pl.reciprocal(den, approx=True)
            inv = inv * (2.0 - den * inv)

            ssim = jnp.where(valid, num * inv, 0.0)          # (H, Wp_a)
            col = jnp.sum(ssim, axis=0, keepdims=True)       # (1, Wp_a)
            # Sublane s of the output block holds slab s's per-lane sums.
            return jnp.where(row_iota == s, col, acc)

        out_ref[0] = lax.fori_loop(0, B, body,
                                   jnp.zeros((8, Wp_a), jnp.float32))

    return kernel


def _vmem_limit_bytes():
    try:
        cap = int(pltpu.get_tpu_info().vmem_capacity_bytes)
    except Exception:
        cap = 64 << 20
    return int(min(max(cap // 2, 32 << 20), 64 << 20))


def _pick_slabs_per_step(n_slabs, slab_bytes, vmem_budget):
    """Slabs per grid step under an honest f32 VMEM working-set estimate."""
    # 2 inputs x 2 pipeline buffers (4*B slabs) + 5-slab staging scratch +
    # ~10 slab-sized live f32 temporaries inside the per-slab loop body.
    cap = max(1, (vmem_budget // slab_bytes - 15) // 4)
    cap = min(cap, 8)                        # one output sublane per slab
    if n_slabs >= 2:
        cap = min(cap, n_slabs // 2)         # keep G >= 2 for megacore (v7x)
    return max(1, min(cap, n_slabs))


def ssim_pallas(img1, img2, window_size=WINDOW_SIZE, size_average=True):
    """SSIM forward, equivalent to SSIM(window_size=11, size_average=...)."""
    N, C, H, W = img1.shape
    P = N * C
    pad = window_size // 2
    S = W + 2 * pad                          # per-plane lane slot (own halo)
    if S <= 128:
        Wp_a = 128
        L = 128 // S                         # planes packed along lanes
    else:
        Wp_a = _round_up(S, 128)
        L = 1
    Hp_a = _round_up(H + 2 * pad, 8)

    n_slabs = -(-P // L)
    slab_bytes = Hp_a * Wp_a * 4             # budget in f32, always
    vmem_limit = _vmem_limit_bytes()
    B = _pick_slabs_per_step(n_slabs, slab_bytes, vmem_limit // 2)
    G = -(-n_slabs // B)
    n_slab_pad = G * B
    P_pad = n_slab_pad * L

    def prep(x):
        # conv halo + lane packing + (8,128) alignment folded into two pads.
        x = x.astype(jnp.float32).reshape(P, H, W)
        x = jnp.pad(x, ((0, P_pad - P), (0, 0), (pad, pad)))    # (P_pad,H,S)
        x = x.reshape(n_slab_pad, L, H, S).transpose(0, 2, 1, 3)
        x = x.reshape(n_slab_pad, H, L * S)
        return jnp.pad(x, ((0, 0), (pad, Hp_a - H - pad), (0, Wp_a - L * S)))

    p1 = prep(img1)
    p2 = prep(img2)

    kernel = _make_ssim_kernel(H, W, Hp_a, Wp_a, S, L, B, window_size)
    in_spec = pl.BlockSpec((B, Hp_a, Wp_a), lambda i: (i, 0, 0))

    cost = pl.CostEstimate(
        flops=int(P) * H * W * 190,
        transcendentals=int(P) * H * W,
        bytes_accessed=2 * n_slab_pad * Hp_a * Wp_a * 4 + G * 8 * Wp_a * 4)

    partials = pl.pallas_call(
        kernel,
        out_shape=jax.ShapeDtypeStruct((G, 8, Wp_a), jnp.float32),
        grid_spec=pltpu.PrefetchScalarGridSpec(
            num_scalar_prefetch=0,
            grid=(G,),
            in_specs=[in_spec, in_spec],
            out_specs=pl.BlockSpec((1, 8, Wp_a), lambda i: (i, 0, 0)),
            scratch_shapes=[pltpu.VMEM((5, Hp_a, Wp_a), jnp.float32)],
        ),
        compiler_params=pltpu.CompilerParams(
            dimension_semantics=("parallel",),
            vmem_limit_bytes=vmem_limit),
        cost_estimate=cost,
    )(p1, p2)

    # partials[g, s, c] = per-lane (column) SSIM-map sums of slab g*B + s.
    col = partials[:, :B, :].reshape(n_slab_pad, Wp_a)[:, :L * S]
    plane_sums = col.reshape(n_slab_pad, L, S)[:, :, :W].sum(-1).reshape(-1)[:P]

    if size_average:
        return jnp.sum(plane_sums) / (P * H * W)
    return plane_sums.reshape(N, C).sum(axis=1) / (C * H * W)


def _ssim_map_reference(img1, img2, window_size=WINDOW_SIZE):
    """Pure-JAX reference (grouped conv), mirrors the PyTorch _ssim()."""
    N, C, H, W = img1.shape
    pad = window_size // 2
    g = jnp.asarray(_gaussian_1d(window_size), jnp.float32)
    w2d = jnp.outer(g, g)
    window = jnp.broadcast_to(w2d, (C, 1, window_size, window_size))

    def conv(x):
        return lax.conv_general_dilated(
            x, window, (1, 1), [(pad, pad), (pad, pad)],
            dimension_numbers=("NCHW", "OIHW", "NCHW"),
            feature_group_count=C,
            precision=lax.Precision.HIGHEST)

    mu1 = conv(img1)
    mu2 = conv(img2)
    mu1_sq, mu2_sq, mu1_mu2 = mu1 * mu1, mu2 * mu2, mu1 * mu2
    sigma1_sq = conv(img1 * img1) - mu1_sq
    sigma2_sq = conv(img2 * img2) - mu2_sq
    sigma12 = conv(img1 * img2) - mu1_mu2
    return ((2 * mu1_mu2 + C1) * (2 * sigma12 + C2)) / \
           ((mu1_sq + mu2_sq + C1) * (sigma1_sq + sigma2_sq + C2))


if __name__ == "__main__":
    key = jax.random.PRNGKey(0)
    k1, k2 = jax.random.split(key)
    img1 = jax.random.uniform(k1, (2, 4, 16, 16), jnp.float32)
    img2 = jax.random.uniform(k2, (2, 4, 16, 16), jnp.float32)

    out = ssim_pallas(img1, img2)
    jax.block_until_ready(out)

    ssim_map = _ssim_map_reference(img1, img2)
    ref_mean = ssim_map.mean()
    if not jnp.allclose(out, ref_mean, atol=1e-4, rtol=1e-4):
        raise AssertionError(
            f"mismatch (size_average=True): pallas={out} ref={ref_mean}")

    out_ns = ssim_pallas(img1, img2, size_average=False)
    jax.block_until_ready(out_ns)
    ref_ns = ssim_map.mean(axis=(1, 2, 3))
    if not jnp.allclose(out_ns, ref_ns, atol=1e-4, rtol=1e-4):
        raise AssertionError(
            f"mismatch (size_average=False): pallas={out_ns} ref={ref_ns}")

    print("KERNEL_OK")
</pallas_src>

<mosaic_0001>
module attributes {stable_mosaic.version = 11 : i64} {
  func.func @kernel(%arg0: i32, %arg1: memref<1x32x128xf32, #tpu.memory_space<vmem>>, %arg2: memref<1x32x128xf32, #tpu.memory_space<vmem>>, %arg3: memref<1x8x128xf32, #tpu.memory_space<vmem>>, %arg4: memref<5x32x128xf32, #tpu.memory_space<vmem>>) attributes {dimension_semantics = [#tpu.dimension_semantics<parallel>], iteration_bounds = array<i64: 2>, scalar_prefetch = 0 : i64, scratch_operands = 1 : i64, tpu.core_type = #tpu.core_type<tc>, window_params = [{transform_indices = @transform_0, window_bounds = array<i64: 1, 32, 128>}, {transform_indices = @transform_1, window_bounds = array<i64: 1, 32, 128>}, {transform_indices = @transform_2, window_bounds = array<i64: 1, 8, 128>}]} {
    %0 = tpu.iota {dimensions = array<i32: 0>} : vector<8x128xi32>
    %1 = tpu.iota {dimensions = array<i32: 1>} : vector<1x128xi32>
    %c0_i32 = arith.constant 0 : i32
    %2 = vector.broadcast %c0_i32 : i32 to vector<1x128xi32>
    %3 = arith.cmpi sge, %1, %2 : vector<1x128xi32>
    %c16_i32 = arith.constant 16 : i32
    %4 = vector.broadcast %c16_i32 : i32 to vector<1x128xi32>
    %5 = arith.cmpi slt, %1, %4 : vector<1x128xi32>
    %6 = arith.andi %3, %5 : vector<1x128xi1>
    %c26_i32 = arith.constant 26 : i32
    %7 = vector.broadcast %c26_i32 : i32 to vector<1x128xi32>
    %8 = arith.cmpi sge, %1, %7 : vector<1x128xi32>
    %c42_i32 = arith.constant 42 : i32
    %9 = vector.broadcast %c42_i32 : i32 to vector<1x128xi32>
    %10 = arith.cmpi slt, %1, %9 : vector<1x128xi32>
    %11 = arith.andi %8, %10 : vector<1x128xi1>
    %12 = arith.ori %6, %11 : vector<1x128xi1>
    %c52_i32 = arith.constant 52 : i32
    %13 = vector.broadcast %c52_i32 : i32 to vector<1x128xi32>
    %14 = arith.cmpi sge, %1, %13 : vector<1x128xi32>
    %c68_i32 = arith.constant 68 : i32
    %15 = vector.broadcast %c68_i32 : i32 to vector<1x128xi32>
    %16 = arith.cmpi slt, %1, %15 : vector<1x128xi32>
    %17 = arith.andi %14, %16 : vector<1x128xi1>
    %18 = arith.ori %12, %17 : vector<1x128xi1>
    %c78_i32 = arith.constant 78 : i32
    %19 = vector.broadcast %c78_i32 : i32 to vector<1x128xi32>
    %20 = arith.cmpi sge, %1, %19 : vector<1x128xi32>
    %c94_i32 = arith.constant 94 : i32
    %21 = vector.broadcast %c94_i32 : i32 to vector<1x128xi32>
    %22 = arith.cmpi slt, %1, %21 : vector<1x128xi32>
    %23 = arith.andi %20, %22 : vector<1x128xi1>
    %24 = arith.ori %18, %23 : vector<1x128xi1>
    %cst = arith.constant 0.000000e+00 : f32
    %25 = vector.broadcast %cst : f32 to vector<8x128xf32>
    %c0_i32_0 = arith.constant 0 : i32
    %26 = arith.index_cast %c0_i32_0 : i32 to index
    %c0 = arith.constant 0 : index
    %c0_1 = arith.constant 0 : index
    %27 = vector.load %arg1[%26, %c0, %c0_1] : memref<1x32x128xf32, #tpu.memory_space<vmem>>, vector<1x32x128xf32>
    %28 = vector.shape_cast %27 : vector<1x32x128xf32> to vector<32x128xf32>
    %29 = arith.index_cast %c0_i32_0 : i32 to index
    %c0_2 = arith.constant 0 : index
    %c0_3 = arith.constant 0 : index
    %30 = vector.load %arg2[%29, %c0_2, %c0_3] : memref<1x32x128xf32, #tpu.memory_space<vmem>>, vector<1x32x128xf32>
    %31 = vector.shape_cast %30 : vector<1x32x128xf32> to vector<32x128xf32>
    %c0_4 = arith.constant 0 : index
    %c0_5 = arith.constant 0 : index
    %c0_6 = arith.constant 0 : index
    %32 = vector.load %arg4[%c0_4, %c0_5, %c0_6] : memref<5x32x128xf32, #tpu.memory_space<vmem>>, vector<1x32x128xf32>
    %33 = vector.shape_cast %32 : vector<1x32x128xf32> to vector<32x128xf32>
    %34 = vector.shape_cast %28 : vector<32x128xf32> to vector<1x32x128xf32>
    tpu.vector_store %arg4[%c0_4, %c0_5, %c0_6], %34 {strides = array<i32>} : memref<5x32x128xf32, #tpu.memory_space<vmem>>, vector<1x32x128xf32>,
    %c1 = arith.constant 1 : index
    %c0_7 = arith.constant 0 : index
    %c0_8 = arith.constant 0 : index
    %35 = vector.load %arg4[%c1, %c0_7, %c0_8] : memref<5x32x128xf32, #tpu.memory_space<vmem>>, vector<1x32x128xf32>
    %36 = vector.shape_cast %35 : vector<1x32x128xf32> to vector<32x128xf32>
    %37 = vector.shape_cast %31 : vector<32x128xf32> to vector<1x32x128xf32>
    tpu.vector_store %arg4[%c1, %c0_7, %c0_8], %37 {strides = array<i32>} : memref<5x32x128xf32, #tpu.memory_space<vmem>>, vector<1x32x128xf32>,
    %38 = arith.mulf %28, %28 : vector<32x128xf32>
    %c2 = arith.constant 2 : index
    %c0_9 = arith.constant 0 : index
    %c0_10 = arith.constant 0 : index
    %39 = vector.load %arg4[%c2, %c0_9, %c0_10] : memref<5x32x128xf32, #tpu.memory_space<vmem>>, vector<1x32x128xf32>
    %40 = vector.shape_cast %39 : vector<1x32x128xf32> to vector<32x128xf32>
    %41 = vector.shape_cast %38 : vector<32x128xf32> to vector<1x32x128xf32>
    tpu.vector_store %arg4[%c2, %c0_9, %c0_10], %41 {strides = array<i32>} : memref<5x32x128xf32, #tpu.memory_space<vmem>>, vector<1x32x128xf32>,
    %42 = arith.mulf %31, %31 : vector<32x128xf32>
    %c3 = arith.constant 3 : index
    %c0_11 = arith.constant 0 : index
    %c0_12 = arith.constant 0 : index
    %43 = vector.load %arg4[%c3, %c0_11, %c0_12] : memref<5x32x128xf32, #tpu.memory_space<vmem>>, vector<1x32x128xf32>
    %44 = vector.shape_cast %43 : vector<1x32x128xf32> to vector<32x128xf32>
    %45 = vector.shape_cast %42 : vector<32x128xf32> to vector<1x32x128xf32>
    tpu.vector_store %arg4[%c3, %c0_11, %c0_12], %45 {strides = array<i32>} : memref<5x32x128xf32, #tpu.memory_space<vmem>>, vector<1x32x128xf32>,
    %46 = arith.mulf %28, %31 : vector<32x128xf32>
    %c4 = arith.constant 4 : index
    %c0_13 = arith.constant 0 : index
    %c0_14 = arith.constant 0 : index
    %47 = vector.load %arg4[%c4, %c0_13, %c0_14] : memref<5x32x128xf32, #tpu.memory_space<vmem>>, vector<1x32x128xf32>
    %48 = vector.shape_cast %47 : vector<1x32x128xf32> to vector<32x128xf32>
    %49 = vector.shape_cast %46 : vector<32x128xf32> to vector<1x32x128xf32>
    tpu.vector_store %arg4[%c4, %c0_13, %c0_14], %49 {strides = array<i32>} : memref<5x32x128xf32, #tpu.memory_space<vmem>>, vector<1x32x128xf32>,
    %c0_15 = arith.constant 0 : index
    %c5 = arith.constant 5 : index
    %c0_16 = arith.constant 0 : index
    %50 = vector.load %arg4[%c0_15, %c5, %c0_16] : memref<5x32x128xf32, #tpu.memory_space<vmem>>, vector<1x16x128xf32>
    %51 = vector.shape_cast %50 : vector<1x16x128xf32> to vector<16x128xf32>
    %cst_17 = arith.constant 0.266011715 : f32
    %52 = vector.broadcast %cst_17 : f32 to vector<16x128xf32>
    %53 = arith.mulf %52, %51 : vector<16x128xf32>
    %c0_18 = arith.constant 0 : index
    %c0_19 = arith.constant 0 : index
    %c0_20 = arith.constant 0 : index
    %54 = vector.load %arg4[%c0_18, %c0_19, %c0_20] : memref<5x32x128xf32, #tpu.memory_space<vmem>>, vector<1x16x128xf32>
    %55 = vector.shape_cast %54 : vector<1x16x128xf32> to vector<16x128xf32>
    %c0_21 = arith.constant 0 : index
    %c10 = arith.constant 10 : index
    %c0_22 = arith.constant 0 : index
    %56 = vector.load %arg4[%c0_21, %c10, %c0_22] : memref<5x32x128xf32, #tpu.memory_space<vmem>>, vector<1x16x128xf32>
    %57 = vector.shape_cast %56 : vector<1x16x128xf32> to vector<16x128xf32>
    %58 = arith.addf %55, %57 : vector<16x128xf32>
    %cst_23 = arith.constant 0.00102838012 : f32
    %59 = vector.broadcast %cst_23 : f32 to vector<16x128xf32>
    %60 = arith.mulf %59, %58 : vector<16x128xf32>
    %61 = arith.addf %53, %60 : vector<16x128xf32>
    %c0_24 = arith.constant 0 : index
    %c1_25 = arith.constant 1 : index
    %c0_26 = arith.constant 0 : index
    %62 = vector.load %arg4[%c0_24, %c1_25, %c0_26] : memref<5x32x128xf32, #tpu.memory_space<vmem>>, vector<1x16x128xf32>
    %63 = vector.shape_cast %62 : vector<1x16x128xf32> to vector<16x128xf32>
    %c0_27 = arith.constant 0 : index
    %c9 = arith.constant 9 : index
    %c0_28 = arith.constant 0 : index
    %64 = vector.load %arg4[%c0_27, %c9, %c0_28] : memref<5x32x128xf32, #tpu.memory_space<vmem>>, vector<1x16x128xf32>
    %65 = vector.shape_cast %64 : vector<1x16x128xf32> to vector<16x128xf32>
    %66 = arith.addf %63, %65 : vector<16x128xf32>
    %cst_29 = arith.constant 0.00759875821 : f32
    %67 = vector.broadcast %cst_29 : f32 to vector<16x128xf32>
    %68 = arith.mulf %67, %66 : vector<16x128xf32>
    %69 = arith.addf %61, %68 : vector<16x128xf32>
    %c0_30 = arith.constant 0 : index
    %c2_31 = arith.constant 2 : index
    %c0_32 = arith.constant 0 : index
    %70 = vector.load %arg4[%c0_30, %c2_31, %c0_32] : memref<5x32x128xf32, #tpu.memory_space<vmem>>, vector<1x16x128xf32>
    %71 = vector.shape_cast %70 : vector<1x16x128xf32> to vector<16x128xf32>
    %c0_33 = arith.constant 0 : index
    %c8 = arith.constant 8 : index
    %c0_34 = arith.constant 0 : index
    %72 = vector.load %arg4[%c0_33, %c8, %c0_34] : memref<5x32x128xf32, #tpu.memory_space<vmem>>, vector<1x16x128xf32>
    %73 = vector.shape_cast %72 : vector<1x16x128xf32> to vector<16x128xf32>
    %74 = arith.addf %71, %73 : vector<16x128xf32>
    %cst_35 = arith.constant 0.0360007733 : f32
    %75 = vector.broadcast %cst_35 : f32 to vector<16x128xf32>
    %76 = arith.mulf %75, %74 : vector<16x128xf32>
    %77 = arith.addf %69, %76 : vector<16x128xf32>
    %c0_36 = arith.constant 0 : index
    %c3_37 = arith.constant 3 : index
    %c0_38 = arith.constant 0 : index
    %78 = vector.load %arg4[%c0_36, %c3_37, %c0_38] : memref<5x32x128xf32, #tpu.memory_space<vmem>>, vector<1x16x128xf32>
    %79 = vector.shape_cast %78 : vector<1x16x128xf32> to vector<16x128xf32>
    %c0_39 = arith.constant 0 : index
    %c7 = arith.constant 7 : index
    %c0_40 = arith.constant 0 : index
    %80 = vector.load %arg4[%c0_39, %c7, %c0_40] : memref<5x32x128xf32, #tpu.memory_space<vmem>>, vector<1x16x128xf32>
    %81 = vector.shape_cast %80 : vector<1x16x128xf32> to vector<16x128xf32>
    %82 = arith.addf %79, %81 : vector<16x128xf32>
    %cst_41 = arith.constant 0.109360687 : f32
    %83 = vector.broadcast %cst_41 : f32 to vector<16x128xf32>
    %84 = arith.mulf %83, %82 : vector<16x128xf32>
    %85 = arith.addf %77, %84 : vector<16x128xf32>
    %c0_42 = arith.constant 0 : index
    %c4_43 = arith.constant 4 : index
    %c0_44 = arith.constant 0 : index
    %86 = vector.load %arg4[%c0_42, %c4_43, %c0_44] : memref<5x32x128xf32, #tpu.memory_space<vmem>>, vector<1x16x128xf32>
    %87 = vector.shape_cast %86 : vector<1x16x128xf32> to vector<16x128xf32>
    %c0_45 = arith.constant 0 : index
    %c6 = arith.constant 6 : index
    %c0_46 = arith.constant 0 : index
    %88 = vector.load %arg4[%c0_45, %c6, %c0_46] : memref<5x32x128xf32, #tpu.memory_space<vmem>>, vector<1x16x128xf32>
    %89 = vector.shape_cast %88 : vector<1x16x128xf32> to vector<16x128xf32>
    %90 = arith.addf %87, %89 : vector<16x128xf32>
    %cst_47 = arith.constant 0.213005543 : f32
    %91 = vector.broadcast %cst_47 : f32 to vector<16x128xf32>
    %92 = arith.mulf %91, %90 : vector<16x128xf32>
    %93 = arith.addf %85, %92 : vector<16x128xf32>
    %c123_i32 = arith.constant 123 : i32
    %94 = tpu.dynamic_rotate %93 by %c123_i32 dim 1 : vector<16x128xf32>, i32 -> vector<16x128xf32>
    %cst_48 = arith.constant 0.266011715 : f32
    %95 = vector.broadcast %cst_48 : f32 to vector<16x128xf32>
    %96 = arith.mulf %95, %94 : vector<16x128xf32>
    %c118_i32 = arith.constant 118 : i32
    %97 = tpu.dynamic_rotate %93 by %c118_i32 dim 1 : vector<16x128xf32>, i32 -> vector<16x128xf32>
    %98 = arith.addf %93, %97 : vector<16x128xf32>
    %cst_49 = arith.constant 0.00102838012 : f32
    %99 = vector.broadcast %cst_49 : f32 to vector<16x128xf32>
    %100 = arith.mulf %99, %98 : vector<16x128xf32>
    %101 = arith.addf %96, %100 : vector<16x128xf32>
    %c127_i32 = arith.constant 127 : i32
    %102 = tpu.dynamic_rotate %93 by %c127_i32 dim 1 : vector<16x128xf32>, i32 -> vector<16x128xf32>
    %c119_i32 = arith.constant 119 : i32
    %103 = tpu.dynamic_rotate %93 by %c119_i32 dim 1 : vector<16x128xf32>, i32 -> vector<16x128xf32>
    %104 = arith.addf %102, %103 : vector<16x128xf32>
    %cst_50 = arith.constant 0.00759875821 : f32
    %105 = vector.broadcast %cst_50 : f32 to vector<16x128xf32>
    %106 = arith.mulf %105, %104 : vector<16x128xf32>
    %107 = arith.addf %101, %106 : vector<16x128xf32>
    %c126_i32 = arith.constant 126 : i32
    %108 = tpu.dynamic_rotate %93 by %c126_i32 dim 1 : vector<16x128xf32>, i32 -> vector<16x128xf32>
    %c120_i32 = arith.constant 120 : i32
    %109 = tpu.dynamic_rotate %93 by %c120_i32 dim 1 : vector<16x128xf32>, i32 -> vector<16x128xf32>
    %110 = arith.addf %108, %109 : vector<16x128xf32>
    %cst_51 = arith.constant 0.0360007733 : f32
    %111 = vector.broadcast %cst_51 : f32 to vector<16x128xf32>
    %112 = arith.mulf %111, %110 : vector<16x128xf32>
    %113 = arith.addf %107, %112 : vector<16x128xf32>
    %c125_i32 = arith.constant 125 : i32
    %114 = tpu.dynamic_rotate %93 by %c125_i32 dim 1 : vector<16x128xf32>, i32 -> vector<16x128xf32>
    %c121_i32 = arith.constant 121 : i32
    %115 = tpu.dynamic_rotate %93 by %c121_i32 dim 1 : vector<16x128xf32>, i32 -> vector<16x128xf32>
    %116 = arith.addf %114, %115 : vector<16x128xf32>
    %cst_52 = arith.constant 0.109360687 : f32
    %117 = vector.broadcast %cst_52 : f32 to vector<16x128xf32>
    %118 = arith.mulf %117, %116 : vector<16x128xf32>
    %119 = arith.addf %113, %118 : vector<16x128xf32>
    %c124_i32 = arith.constant 124 : i32
    %120 = tpu.dynamic_rotate %93 by %c124_i32 dim 1 : vector<16x128xf32>, i32 -> vector<16x128xf32>
    %c122_i32 = arith.constant 122 : i32
    %121 = tpu.dynamic_rotate %93 by %c122_i32 dim 1 : vector<16x128xf32>, i32 -> vector<16x128xf32>
    %122 = arith.addf %120, %121 : vector<16x128xf32>
    %cst_53 = arith.constant 0.213005543 : f32
    %123 = vector.broadcast %cst_53 : f32 to vector<16x128xf32>
    %124 = arith.mulf %123, %122 : vector<16x128xf32>
    %125 = arith.addf %119, %124 : vector<16x128xf32>
    %c1_54 = arith.constant 1 : index
    %c5_55 = arith.constant 5 : index
    %c0_56 = arith.constant 0 : index
    %126 = vector.load %arg4[%c1_54, %c5_55, %c0_56] : memref<5x32x128xf32, #tpu.memory_space<vmem>>, vector<1x16x128xf32>
    %127 = vector.shape_cast %126 : vector<1x16x128xf32> to vector<16x128xf32>
    %cst_57 = arith.constant 0.266011715 : f32
    %128 = vector.broadcast %cst_57 : f32 to vector<16x128xf32>
    %129 = arith.mulf %128, %127 : vector<16x128xf32>
    %c1_58 = arith.constant 1 : index
    %c0_59 = arith.constant 0 : index
    %c0_60 = arith.constant 0 : index
    %130 = vector.load %arg4[%c1_58, %c0_59, %c0_60] : memref<5x32x128xf32, #tpu.memory_space<vmem>>, vector<1x16x128xf32>
    %131 = vector.shape_cast %130 : vector<1x16x128xf32> to vector<16x128xf32>
    %c1_61 = arith.constant 1 : index
    %c10_62 = arith.constant 10 : index
    %c0_63 = arith.constant 0 : index
    %132 = vector.load %arg4[%c1_61, %c10_62, %c0_63] : memref<5x32x128xf32, #tpu.memory_space<vmem>>, vector<1x16x128xf32>
    %133 = vector.shape_cast %132 : vector<1x16x128xf32> to vector<16x128xf32>
    %134 = arith.addf %131, %133 : vector<16x128xf32>
    %cst_64 = arith.constant 0.00102838012 : f32
    %135 = vector.broadcast %cst_64 : f32 to vector<16x128xf32>
    %136 = arith.mulf %135, %134 : vector<16x128xf32>
    %137 = arith.addf %129, %136 : vector<16x128xf32>
    %c1_65 = arith.constant 1 : index
    %c1_66 = arith.constant 1 : index
    %c0_67 = arith.constant 0 : index
    %138 = vector.load %arg4[%c1_65, %c1_66, %c0_67] : memref<5x32x128xf32, #tpu.memory_space<vmem>>, vector<1x16x128xf32>
    %139 = vector.shape_cast %138 : vector<1x16x128xf32> to vector<16x128xf32>
    %c1_68 = arith.constant 1 : index
    %c9_69 = arith.constant 9 : index
    %c0_70 = arith.constant 0 : index
    %140 = vector.load %arg4[%c1_68, %c9_69, %c0_70] : memref<5x32x128xf32, #tpu.memory_space<vmem>>, vector<1x16x128xf32>
    %141 = vector.shape_cast %140 : vector<1x16x128xf32> to vector<16x128xf32>
    %142 = arith.addf %139, %141 : vector<16x128xf32>
    %cst_71 = arith.constant 0.00759875821 : f32
    %143 = vector.broadcast %cst_71 : f32 to vector<16x128xf32>
    %144 = arith.mulf %143, %142 : vector<16x128xf32>
    %145 = arith.addf %137, %144 : vector<16x128xf32>
    %c1_72 = arith.constant 1 : index
    %c2_73 = arith.constant 2 : index
    %c0_74 = arith.constant 0 : index
    %146 = vector.load %arg4[%c1_72, %c2_73, %c0_74] : memref<5x32x128xf32, #tpu.memory_space<vmem>>, vector<1x16x128xf32>
    %147 = vector.shape_cast %146 : vector<1x16x128xf32> to vector<16x128xf32>
    %c1_75 = arith.constant 1 : index
    %c8_76 = arith.constant 8 : index
    %c0_77 = arith.constant 0 : index
    %148 = vector.load %arg4[%c1_75, %c8_76, %c0_77] : memref<5x32x128xf32, #tpu.memory_space<vmem>>, vector<1x16x128xf32>
    %149 = vector.shape_cast %148 : vector<1x16x128xf32> to vector<16x128xf32>
    %150 = arith.addf %147, %149 : vector<16x128xf32>
    %cst_78 = arith.constant 0.0360007733 : f32
    %151 = vector.broadcast %cst_78 : f32 to vector<16x128xf32>
    %152 = arith.mulf %151, %150 : vector<16x128xf32>
    %153 = arith.addf %145, %152 : vector<16x128xf32>
    %c1_79 = arith.constant 1 : index
    %c3_80 = arith.constant 3 : index
    %c0_81 = arith.constant 0 : index
    %154 = vector.load %arg4[%c1_79, %c3_80, %c0_81] : memref<5x32x128xf32, #tpu.memory_space<vmem>>, vector<1x16x128xf32>
    %155 = vector.shape_cast %154 : vector<1x16x128xf32> to vector<16x128xf32>
    %c1_82 = arith.constant 1 : index
    %c7_83 = arith.constant 7 : index
    %c0_84 = arith.constant 0 : index
    %156 = vector.load %arg4[%c1_82, %c7_83, %c0_84] : memref<5x32x128xf32, #tpu.memory_space<vmem>>, vector<1x16x128xf32>
    %157 = vector.shape_cast %156 : vector<1x16x128xf32> to vector<16x128xf32>
    %158 = arith.addf %155, %157 : vector<16x128xf32>
    %cst_85 = arith.constant 0.109360687 : f32
    %159 = vector.broadcast %cst_85 : f32 to vector<16x128xf32>
    %160 = arith.mulf %159, %158 : vector<16x128xf32>
    %161 = arith.addf %153, %160 : vector<16x128xf32>
    %c1_86 = arith.constant 1 : index
    %c4_87 = arith.constant 4 : index
    %c0_88 = arith.constant 0 : index
    %162 = vector.load %arg4[%c1_86, %c4_87, %c0_88] : memref<5x32x128xf32, #tpu.memory_space<vmem>>, vector<1x16x128xf32>
    %163 = vector.shape_cast %162 : vector<1x16x128xf32> to vector<16x128xf32>
    %c1_89 = arith.constant 1 : index
    %c6_90 = arith.constant 6 : index
    %c0_91 = arith.constant 0 : index
    %164 = vector.load %arg4[%c1_89, %c6_90, %c0_91] : memref<5x32x128xf32, #tpu.memory_space<vmem>>, vector<1x16x128xf32>
    %165 = vector.shape_cast %164 : vector<1x16x128xf32> to vector<16x128xf32>
    %166 = arith.addf %163, %165 : vector<16x128xf32>
    %cst_92 = arith.constant 0.213005543 : f32
    %167 = vector.broadcast %cst_92 : f32 to vector<16x128xf32>
    %168 = arith.mulf %167, %166 : vector<16x128xf32>
    %169 = arith.addf %161, %168 : vector<16x128xf32>
    %c123_i32_93 = arith.constant 123 : i32
    %170 = tpu.dynamic_rotate %169 by %c123_i32_93 dim 1 : vector<16x128xf32>, i32 -> vector<16x128xf32>
    %cst_94 = arith.constant 0.266011715 : f32
    %171 = vector.broadcast %cst_94 : f32 to vector<16x128xf32>
    %172 = arith.mulf %171, %170 : vector<16x128xf32>
    %c118_i32_95 = arith.constant 118 : i32
    %173 = tpu.dynamic_rotate %169 by %c118_i32_95 dim 1 : vector<16x128xf32>, i32 -> vector<16x128xf32>
    %174 = arith.addf %169, %173 : vector<16x128xf32>
    %cst_96 = arith.constant 0.00102838012 : f32
    %175 = vector.broadcast %cst_96 : f32 to vector<16x128xf32>
    %176 = arith.mulf %175, %174 : vector<16x128xf32>
    %177 = arith.addf %172, %176 : vector<16x128xf32>
    %c127_i32_97 = arith.constant 127 : i32
    %178 = tpu.dynamic_rotate %169 by %c127_i32_97 dim 1 : vector<16x128xf32>, i32 -> vector<16x128xf32>
    %c119_i32_98 = arith.constant 119 : i32
    %179 = tpu.dynamic_rotate %169 by %c119_i32_98 dim 1 : vector<16x128xf32>, i32 -> vector<16x128xf32>
    %180 = arith.addf %178, %179 : vector<16x128xf32>
    %cst_99 = arith.constant 0.00759875821 : f32
    %181 = vector.broadcast %cst_99 : f32 to vector<16x128xf32>
    %182 = arith.mulf %181, %180 : vector<16x128xf32>
    %183 = arith.addf %177, %182 : vector<16x128xf32>
    %c126_i32_100 = arith.constant 126 : i32
    %184 = tpu.dynamic_rotate %169 by %c126_i32_100 dim 1 : vector<16x128xf32>, i32 -> vector<16x128xf32>
    %c120_i32_101 = arith.constant 120 : i32
    %185 = tpu.dynamic_rotate %169 by %c120_i32_101 dim 1 : vector<16x128xf32>, i32 -> vector<16x128xf32>
    %186 = arith.addf %184, %185 : vector<16x128xf32>
    %cst_102 = arith.constant 0.0360007733 : f32
    %187 = vector.broadcast %cst_102 : f32 to vector<16x128xf32>
    %188 = arith.mulf %187, %186 : vector<16x128xf32>
    %189 = arith.addf %183, %188 : vector<16x128xf32>
    %c125_i32_103 = arith.constant 125 : i32
    %190 = tpu.dynamic_rotate %169 by %c125_i32_103 dim 1 : vector<16x128xf32>, i32 -> vector<16x128xf32>
    %c121_i32_104 = arith.constant 121 : i32
    %191 = tpu.dynamic_rotate %169 by %c121_i32_104 dim 1 : vector<16x128xf32>, i32 -> vector<16x128xf32>
    %192 = arith.addf %190, %191 : vector<16x128xf32>
    %cst_105 = arith.constant 0.109360687 : f32
    %193 = vector.broadcast %cst_105 : f32 to vector<16x128xf32>
    %194 = arith.mulf %193, %192 : vector<16x128xf32>
    %195 = arith.addf %189, %194 : vector<16x128xf32>
    %c124_i32_106 = arith.constant 124 : i32
    %196 = tpu.dynamic_rotate %169 by %c124_i32_106 dim 1 : vector<16x128xf32>, i32 -> vector<16x128xf32>
    %c122_i32_107 = arith.constant 122 : i32
    %197 = tpu.dynamic_rotate %169 by %c122_i32_107 dim 1 : vector<16x128xf32>, i32 -> vector<16x128xf32>
    %198 = arith.addf %196, %197 : vector<16x128xf32>
    %cst_108 = arith.constant 0.213005543 : f32
    %199 = vector.broadcast %cst_108 : f32 to vector<16x128xf32>
    %200 = arith.mulf %199, %198 : vector<16x128xf32>
    %201 = arith.addf %195, %200 : vector<16x128xf32>
    %c2_109 = arith.constant 2 : index
    %c5_110 = arith.constant 5 : index
    %c0_111 = arith.constant 0 : index
    %202 = vector.load %arg4[%c2_109, %c5_110, %c0_111] : memref<5x32x128xf32, #tpu.memory_space<vmem>>, vector<1x16x128xf32>
    %203 = vector.shape_cast %202 : vector<1x16x128xf32> to vector<16x128xf32>
    %cst_112 = arith.constant 0.266011715 : f32
    %204 = vector.broadcast %cst_112 : f32 to vector<16x128xf32>
    %205 = arith.mulf %204, %203 : vector<16x128xf32>
    %c2_113 = arith.constant 2 : index
    %c0_114 = arith.constant 0 : index
    %c0_115 = arith.constant 0 : index
    %206 = vector.load %arg4[%c2_113, %c0_114, %c0_115] : memref<5x32x128xf32, #tpu.memory_space<vmem>>, vector<1x16x128xf32>
    %207 = vector.shape_cast %206 : vector<1x16x128xf32> to vector<16x128xf32>
    %c2_116 = arith.constant 2 : index
    %c10_117 = arith.constant 10 : index
    %c0_118 = arith.constant 0 : index
    %208 = vector.load %arg4[%c2_116, %c10_117, %c0_118] : memref<5x32x128xf32, #tpu.memory_space<vmem>>, vector<1x16x128xf32>
    %209 = vector.shape_cast %208 : vector<1x16x128xf32> to vector<16x128xf32>
    %210 = arith.addf %207, %209 : vector<16x128xf32>
    %cst_119 = arith.constant 0.00102838012 : f32
    %211 = vector.broadcast %cst_119 : f32 to vector<16x128xf32>
    %212 = arith.mulf %211, %210 : vector<16x128xf32>
    %213 = arith.addf %205, %212 : vector<16x128xf32>
    %c2_120 = arith.constant 2 : index
    %c1_121 = arith.constant 1 : index
    %c0_122 = arith.constant 0 : index
    %214 = vector.load %arg4[%c2_120, %c1_121, %c0_122] : memref<5x32x128xf32, #tpu.memory_space<vmem>>, vector<1x16x128xf32>
    %215 = vector.shape_cast %214 : vector<1x16x128xf32> to vector<16x128xf32>
    %c2_123 = arith.constant 2 : index
    %c9_124 = arith.constant 9 : index
    %c0_125 = arith.constant 0 : index
    %216 = vector.load %arg4[%c2_123, %c9_124, %c0_125] : memref<5x32x128xf32, #tpu.memory_space<vmem>>, vector<1x16x128xf32>
    %217 = vector.shape_cast %216 : vector<1x16x128xf32> to vector<16x128xf32>
    %218 = arith.addf %215, %217 : vector<16x128xf32>
    %cst_126 = arith.constant 0.00759875821 : f32
    %219 = vector.broadcast %cst_126 : f32 to vector<16x128xf32>
    %220 = arith.mulf %219, %218 : vector<16x128xf32>
    %221 = arith.addf %213, %220 : vector<16x128xf32>
    %c2_127 = arith.constant 2 : index
    %c2_128 = arith.constant 2 : index
    %c0_129 = arith.constant 0 : index
    %222 = vector.load %arg4[%c2_127, %c2_128, %c0_129] : memref<5x32x128xf32, #tpu.memory_space<vmem>>, vector<1x16x128xf32>
    %223 = vector.shape_cast %222 : vector<1x16x128xf32> to vector<16x128xf32>
    %c2_130 = arith.constant 2 : index
    %c8_131 = arith.constant 8 : index
    %c0_132 = arith.constant 0 : index
    %224 = vector.load %arg4[%c2_130, %c8_131, %c0_132] : memref<5x32x128xf32, #tpu.memory_space<vmem>>, vector<1x16x128xf32>
    %225 = vector.shape_cast %224 : vector<1x16x128xf32> to vector<16x128xf32>
    %226 = arith.addf %223, %225 : vector<16x128xf32>
    %cst_133 = arith.constant 0.0360007733 : f32
    %227 = vector.broadcast %cst_133 : f32 to vector<16x128xf32>
    %228 = arith.mulf %227, %226 : vector<16x128xf32>
    %229 = arith.addf %221, %228 : vector<16x128xf32>
    %c2_134 = arith.constant 2 : index
    %c3_135 = arith.constant 3 : index
    %c0_136 = arith.constant 0 : index
    %230 = vector.load %arg4[%c2_134, %c3_135, %c0_136] : memref<5x32x128xf32, #tpu.memory_space<vmem>>, vector<1x16x128xf32>
    %231 = vector.shape_cast %230 : vector<1x16x128xf32> to vector<16x128xf32>
    %c2_137 = arith.constant 2 : index
    %c7_138 = arith.constant 7 : index
    %c0_139 = arith.constant 0 : index
    %232 = vector.load %arg4[%c2_137, %c7_138, %c0_139] : memref<5x32x128xf32, #tpu.memory_space<vmem>>, vector<1x16x128xf32>
    %233 = vector.shape_cast %232 : vector<1x16x128xf32> to vector<16x128xf32>
    %234 = arith.addf %231, %233 : vector<16x128xf32>
    %cst_140 = arith.constant 0.109360687 : f32
    %235 = vector.broadcast %cst_140 : f32 to vector<16x128xf32>
    %236 = arith.mulf %235, %234 : vector<16x128xf32>
    %237 = arith.addf %229, %236 : vector<16x128xf32>
    %c2_141 = arith.constant 2 : index
    %c4_142 = arith.constant 4 : index
    %c0_143 = arith.constant 0 : index
    %238 = vector.load %arg4[%c2_141, %c4_142, %c0_143] : memref<5x32x128xf32, #tpu.memory_space<vmem>>, vector<1x16x128xf32>
    %239 = vector.shape_cast %238 : vector<1x16x128xf32> to vector<16x128xf32>
    %c2_144 = arith.constant 2 : index
    %c6_145 = arith.constant 6 : index
    %c0_146 = arith.constant 0 : index
    %240 = vector.load %arg4[%c2_144, %c6_145, %c0_146] : memref<5x32x128xf32, #tpu.memory_space<vmem>>, vector<1x16x128xf32>
    %241 = vector.shape_cast %240 : vector<1x16x128xf32> to vector<16x128xf32>
    %242 = arith.addf %239, %241 : vector<16x128xf32>
    %cst_147 = arith.constant 0.213005543 : f32
    %243 = vector.broadcast %cst_147 : f32 to vector<16x128xf32>
    %244 = arith.mulf %243, %242 : vector<16x128xf32>
    %245 = arith.addf %237, %244 : vector<16x128xf32>
    %c123_i32_148 = arith.constant 123 : i32
    %246 = tpu.dynamic_rotate %245 by %c123_i32_148 dim 1 : vector<16x128xf32>, i32 -> vector<16x128xf32>
    %cst_149 = arith.constant 0.266011715 : f32
    %247 = vector.broadcast %cst_149 : f32 to vector<16x128xf32>
    %248 = arith.mulf %247, %246 : vector<16x128xf32>
    %c118_i32_150 = arith.constant 118 : i32
    %249 = tpu.dynamic_rotate %245 by %c118_i32_150 dim 1 : vector<16x128xf32>, i32 -> vector<16x128xf32>
    %250 = arith.addf %245, %249 : vector<16x128xf32>
    %cst_151 = arith.constant 0.00102838012 : f32
    %251 = vector.broadcast %cst_151 : f32 to vector<16x128xf32>
    %252 = arith.mulf %251, %250 : vector<16x128xf32>
    %253 = arith.addf %248, %252 : vector<16x128xf32>
    %c127_i32_152 = arith.constant 127 : i32
    %254 = tpu.dynamic_rotate %245 by %c127_i32_152 dim 1 : vector<16x128xf32>, i32 -> vector<16x128xf32>
    %c119_i32_153 = arith.constant 119 : i32
    %255 = tpu.dynamic_rotate %245 by %c119_i32_153 dim 1 : vector<16x128xf32>, i32 -> vector<16x128xf32>
    %256 = arith.addf %254, %255 : vector<16x128xf32>
    %cst_154 = arith.constant 0.00759875821 : f32
    %257 = vector.broadcast %cst_154 : f32 to vector<16x128xf32>
    %258 = arith.mulf %257, %256 : vector<16x128xf32>
    %259 = arith.addf %253, %258 : vector<16x128xf32>
    %c126_i32_155 = arith.constant 126 : i32
    %260 = tpu.dynamic_rotate %245 by %c126_i32_155 dim 1 : vector<16x128xf32>, i32 -> vector<16x128xf32>
    %c120_i32_156 = arith.constant 120 : i32
    %261 = tpu.dynamic_rotate %245 by %c120_i32_156 dim 1 : vector<16x128xf32>, i32 -> vector<16x128xf32>
    %262 = arith.addf %260, %261 : vector<16x128xf32>
    %cst_157 = arith.constant 0.0360007733 : f32
    %263 = vector.broadcast %cst_157 : f32 to vector<16x128xf32>
    %264 = arith.mulf %263, %262 : vector<16x128xf32>
    %265 = arith.addf %259, %264 : vector<16x128xf32>
    %c125_i32_158 = arith.constant 125 : i32
    %266 = tpu.dynamic_rotate %245 by %c125_i32_158 dim 1 : vector<16x128xf32>, i32 -> vector<16x128xf32>
    %c121_i32_159 = arith.constant 121 : i32
    %267 = tpu.dynamic_rotate %245 by %c121_i32_159 dim 1 : vector<16x128xf32>, i32 -> vector<16x128xf32>
    %268 = arith.addf %266, %267 : vector<16x128xf32>
    %cst_160 = arith.constant 0.109360687 : f32
    %269 = vector.broadcast %cst_160 : f32 to vector<16x128xf32>
    %270 = arith.mulf %269, %268 : vector<16x128xf32>
    %271 = arith.addf %265, %270 : vector<16x128xf32>
    %c124_i32_161 = arith.constant 124 : i32
    %272 = tpu.dynamic_rotate %245 by %c124_i32_161 dim 1 : vector<16x128xf32>, i32 -> vector<16x128xf32>
    %c122_i32_162 = arith.constant 122 : i32
    %273 = tpu.dynamic_rotate %245 by %c122_i32_162 dim 1 : vector<16x128xf32>, i32 -> vector<16x128xf32>
    %274 = arith.addf %272, %273 : vector<16x128xf32>
    %cst_163 = arith.constant 0.213005543 : f32
    %275 = vector.broadcast %cst_163 : f32 to vector<16x128xf32>
    %276 = arith.mulf %275, %274 : vector<16x128xf32>
    %277 = arith.addf %271, %276 : vector<16x128xf32>
    %c3_164 = arith.constant 3 : index
    %c5_165 = arith.constant 5 : index
    %c0_166 = arith.constant 0 : index
    %278 = vector.load %arg4[%c3_164, %c5_165, %c0_166] : memref<5x32x128xf32, #tpu.memory_space<vmem>>, vector<1x16x128xf32>
    %279 = vector.shape_cast %278 : vector<1x16x128xf32> to vector<16x128xf32>
    %cst_167 = arith.constant 0.266011715 : f32
    %280 = vector.broadcast %cst_167 : f32 to vector<16x128xf32>
    %281 = arith.mulf %280, %279 : vector<16x128xf32>
    %c3_168 = arith.constant 3 : index
    %c0_169 = arith.constant 0 : index
    %c0_170 = arith.constant 0 : index
    %282 = vector.load %arg4[%c3_168, %c0_169, %c0_170] : memref<5x32x128xf32, #tpu.memory_space<vmem>>, vector<1x16x128xf32>
    %283 = vector.shape_cast %282 : vector<1x16x128xf32> to vector<16x128xf32>
    %c3_171 = arith.constant 3 : index
    %c10_172 = arith.constant 10 : index
    %c0_173 = arith.constant 0 : index
    %284 = vector.load %arg4[%c3_171, %c10_172, %c0_173] : memref<5x32x128xf32, #tpu.memory_space<vmem>>, vector<1x16x128xf32>
    %285 = vector.shape_cast %284 : vector<1x16x128xf32> to vector<16x128xf32>
    %286 = arith.addf %283, %285 : vector<16x128xf32>
    %cst_174 = arith.constant 0.00102838012 : f32
    %287 = vector.broadcast %cst_174 : f32 to vector<16x128xf32>
    %288 = arith.mulf %287, %286 : vector<16x128xf32>
    %289 = arith.addf %281, %288 : vector<16x128xf32>
    %c3_175 = arith.constant 3 : index
    %c1_176 = arith.constant 1 : index
    %c0_177 = arith.constant 0 : index
    %290 = vector.load %arg4[%c3_175, %c1_176, %c0_177] : memref<5x32x128xf32, #tpu.memory_space<vmem>>, vector<1x16x128xf32>
    %291 = vector.shape_cast %290 : vector<1x16x128xf32> to vector<16x128xf32>
    %c3_178 = arith.constant 3 : index
    %c9_179 = arith.constant 9 : index
    %c0_180 = arith.constant 0 : index
    %292 = vector.load %arg4[%c3_178, %c9_179, %c0_180] : memref<5x32x128xf32, #tpu.memory_space<vmem>>, vector<1x16x128xf32>
    %293 = vector.shape_cast %292 : vector<1x16x128xf32> to vector<16x128xf32>
    %294 = arith.addf %291, %293 : vector<16x128xf32>
    %cst_181 = arith.constant 0.00759875821 : f32
    %295 = vector.broadcast %cst_181 : f32 to vector<16x128xf32>
    %296 = arith.mulf %295, %294 : vector<16x128xf32>
    %297 = arith.addf %289, %296 : vector<16x128xf32>
    %c3_182 = arith.constant 3 : index
    %c2_183 = arith.constant 2 : index
    %c0_184 = arith.constant 0 : index
    %298 = vector.load %arg4[%c3_182, %c2_183, %c0_184] : memref<5x32x128xf32, #tpu.memory_space<vmem>>, vector<1x16x128xf32>
    %299 = vector.shape_cast %298 : vector<1x16x128xf32> to vector<16x128xf32>
    %c3_185 = arith.constant 3 : index
    %c8_186 = arith.constant 8 : index
    %c0_187 = arith.constant 0 : index
    %300 = vector.load %arg4[%c3_185, %c8_186, %c0_187] : memref<5x32x128xf32, #tpu.memory_space<vmem>>, vector<1x16x128xf32>
    %301 = vector.shape_cast %300 : vector<1x16x128xf32> to vector<16x128xf32>
    %302 = arith.addf %299, %301 : vector<16x128xf32>
    %cst_188 = arith.constant 0.0360007733 : f32
    %303 = vector.broadcast %cst_188 : f32 to vector<16x128xf32>
    %304 = arith.mulf %303, %302 : vector<16x128xf32>
    %305 = arith.addf %297, %304 : vector<16x128xf32>
    %c3_189 = arith.constant 3 : index
    %c3_190 = arith.constant 3 : index
    %c0_191 = arith.constant 0 : index
    %306 = vector.load %arg4[%c3_189, %c3_190, %c0_191] : memref<5x32x128xf32, #tpu.memory_space<vmem>>, vector<1x16x128xf32>
    %307 = vector.shape_cast %306 : vector<1x16x128xf32> to vector<16x128xf32>
    %c3_192 = arith.constant 3 : index
    %c7_193 = arith.constant 7 : index
    %c0_194 = arith.constant 0 : index
    %308 = vector.load %arg4[%c3_192, %c7_193, %c0_194] : memref<5x32x128xf32, #tpu.memory_space<vmem>>, vector<1x16x128xf32>
    %309 = vector.shape_cast %308 : vector<1x16x128xf32> to vector<16x128xf32>
    %310 = arith.addf %307, %309 : vector<16x128xf32>
    %cst_195 = arith.constant 0.109360687 : f32
    %311 = vector.broadcast %cst_195 : f32 to vector<16x128xf32>
    %312 = arith.mulf %311, %310 : vector<16x128xf32>
    %313 = arith.addf %305, %312 : vector<16x128xf32>
    %c3_196 = arith.constant 3 : index
    %c4_197 = arith.constant 4 : index
    %c0_198 = arith.constant 0 : index
    %314 = vector.load %arg4[%c3_196, %c4_197, %c0_198] : memref<5x32x128xf32, #tpu.memory_space<vmem>>, vector<1x16x128xf32>
    %315 = vector.shape_cast %314 : vector<1x16x128xf32> to vector<16x128xf32>
    %c3_199 = arith.constant 3 : index
    %c6_200 = arith.constant 6 : index
    %c0_201 = arith.constant 0 : index
    %316 = vector.load %arg4[%c3_199, %c6_200, %c0_201] : memref<5x32x128xf32, #tpu.memory_space<vmem>>, vector<1x16x128xf32>
    %317 = vector.shape_cast %316 : vector<1x16x128xf32> to vector<16x128xf32>
    %318 = arith.addf %315, %317 : vector<16x128xf32>
    %cst_202 = arith.constant 0.213005543 : f32
    %319 = vector.broadcast %cst_202 : f32 to vector<16x128xf32>
    %320 = arith.mulf %319, %318 : vector<16x128xf32>
    %321 = arith.addf %313, %320 : vector<16x128xf32>
    %c123_i32_203 = arith.constant 123 : i32
    %322 = tpu.dynamic_rotate %321 by %c123_i32_203 dim 1 : vector<16x128xf32>, i32 -> vector<16x128xf32>
    %cst_204 = arith.constant 0.266011715 : f32
    %323 = vector.broadcast %cst_204 : f32 to vector<16x128xf32>
    %324 = arith.mulf %323, %322 : vector<16x128xf32>
    %c118_i32_205 = arith.constant 118 : i32
    %325 = tpu.dynamic_rotate %321 by %c118_i32_205 dim 1 : vector<16x128xf32>, i32 -> vector<16x128xf32>
    %326 = arith.addf %321, %325 : vector<16x128xf32>
    %cst_206 = arith.constant 0.00102838012 : f32
    %327 = vector.broadcast %cst_206 : f32 to vector<16x128xf32>
    %328 = arith.mulf %327, %326 : vector<16x128xf32>
    %329 = arith.addf %324, %328 : vector<16x128xf32>
    %c127_i32_207 = arith.constant 127 : i32
    %330 = tpu.dynamic_rotate %321 by %c127_i32_207 dim 1 : vector<16x128xf32>, i32 -> vector<16x128xf32>
    %c119_i32_208 = arith.constant 119 : i32
    %331 = tpu.dynamic_rotate %321 by %c119_i32_208 dim 1 : vector<16x128xf32>, i32 -> vector<16x128xf32>
    %332 = arith.addf %330, %331 : vector<16x128xf32>
    %cst_209 = arith.constant 0.00759875821 : f32
    %333 = vector.broadcast %cst_209 : f32 to vector<16x128xf32>
    %334 = arith.mulf %333, %332 : vector<16x128xf32>
    %335 = arith.addf %329, %334 : vector<16x128xf32>
    %c126_i32_210 = arith.constant 126 : i32
    %336 = tpu.dynamic_rotate %321 by %c126_i32_210 dim 1 : vector<16x128xf32>, i32 -> vector<16x128xf32>
    %c120_i32_211 = arith.constant 120 : i32
    %337 = tpu.dynamic_rotate %321 by %c120_i32_211 dim 1 : vector<16x128xf32>, i32 -> vector<16x128xf32>
    %338 = arith.addf %336, %337 : vector<16x128xf32>
    %cst_212 = arith.constant 0.0360007733 : f32
    %339 = vector.broadcast %cst_212 : f32 to vector<16x128xf32>
    %340 = arith.mulf %339, %338 : vector<16x128xf32>
    %341 = arith.addf %335, %340 : vector<16x128xf32>
    %c125_i32_213 = arith.constant 125 : i32
    %342 = tpu.dynamic_rotate %321 by %c125_i32_213 dim 1 : vector<16x128xf32>, i32 -> vector<16x128xf32>
    %c121_i32_214 = arith.constant 121 : i32
    %343 = tpu.dynamic_rotate %321 by %c121_i32_214 dim 1 : vector<16x128xf32>, i32 -> vector<16x128xf32>
    %344 = arith.addf %342, %343 : vector<16x128xf32>
    %cst_215 = arith.constant 0.109360687 : f32
    %345 = vector.broadcast %cst_215 : f32 to vector<16x128xf32>
    %346 = arith.mulf %345, %344 : vector<16x128xf32>
    %347 = arith.addf %341, %346 : vector<16x128xf32>
    %c124_i32_216 = arith.constant 124 : i32
    %348 = tpu.dynamic_rotate %321 by %c124_i32_216 dim 1 : vector<16x128xf32>, i32 -> vector<16x128xf32>
    %c122_i32_217 = arith.constant 122 : i32
    %349 = tpu.dynamic_rotate %321 by %c122_i32_217 dim 1 : vector<16x128xf32>, i32 -> vector<16x128xf32>
    %350 = arith.addf %348, %349 : vector<16x128xf32>
    %cst_218 = arith.constant 0.213005543 : f32
    %351 = vector.broadcast %cst_218 : f32 to vector<16x128xf32>
    %352 = arith.mulf %351, %350 : vector<16x128xf32>
    %353 = arith.addf %347, %352 : vector<16x128xf32>
    %c4_219 = arith.constant 4 : index
    %c5_220 = arith.constant 5 : index
    %c0_221 = arith.constant 0 : index
    %354 = vector.load %arg4[%c4_219, %c5_220, %c0_221] : memref<5x32x128xf32, #tpu.memory_space<vmem>>, vector<1x16x128xf32>
    %355 = vector.shape_cast %354 : vector<1x16x128xf32> to vector<16x128xf32>
    %cst_222 = arith.constant 0.266011715 : f32
    %356 = vector.broadcast %cst_222 : f32 to vector<16x128xf32>
    %357 = arith.mulf %356, %355 : vector<16x128xf32>
    %c4_223 = arith.constant 4 : index
    %c0_224 = arith.constant 0 : index
    %c0_225 = arith.constant 0 : index
    %358 = vector.load %arg4[%c4_223, %c0_224, %c0_225] : memref<5x32x128xf32, #tpu.memory_space<vmem>>, vector<1x16x128xf32>
    %359 = vector.shape_cast %358 : vector<1x16x128xf32> to vector<16x128xf32>
    %c4_226 = arith.constant 4 : index
    %c10_227 = arith.constant 10 : index
    %c0_228 = arith.constant 0 : index
    %360 = vector.load %arg4[%c4_226, %c10_227, %c0_228] : memref<5x32x128xf32, #tpu.memory_space<vmem>>, vector<1x16x128xf32>
    %361 = vector.shape_cast %360 : vector<1x16x128xf32> to vector<16x128xf32>
    %362 = arith.addf %359, %361 : vector<16x128xf32>
    %cst_229 = arith.constant 0.00102838012 : f32
    %363 = vector.broadcast %cst_229 : f32 to vector<16x128xf32>
    %364 = arith.mulf %363, %362 : vector<16x128xf32>
    %365 = arith.addf %357, %364 : vector<16x128xf32>
    %c4_230 = arith.constant 4 : index
    %c1_231 = arith.constant 1 : index
    %c0_232 = arith.constant 0 : index
    %366 = vector.load %arg4[%c4_230, %c1_231, %c0_232] : memref<5x32x128xf32, #tpu.memory_space<vmem>>, vector<1x16x128xf32>
    %367 = vector.shape_cast %366 : vector<1x16x128xf32> to vector<16x128xf32>
    %c4_233 = arith.constant 4 : index
    %c9_234 = arith.constant 9 : index
    %c0_235 = arith.constant 0 : index
    %368 = vector.load %arg4[%c4_233, %c9_234, %c0_235] : memref<5x32x128xf32, #tpu.memory_space<vmem>>, vector<1x16x128xf32>
    %369 = vector.shape_cast %368 : vector<1x16x128xf32> to vector<16x128xf32>
    %370 = arith.addf %367, %369 : vector<16x128xf32>
    %cst_236 = arith.constant 0.00759875821 : f32
    %371 = vector.broadcast %cst_236 : f32 to vector<16x128xf32>
    %372 = arith.mulf %371, %370 : vector<16x128xf32>
    %373 = arith.addf %365, %372 : vector<16x128xf32>
    %c4_237 = arith.constant 4 : index
    %c2_238 = arith.constant 2 : index
    %c0_239 = arith.constant 0 : index
    %374 = vector.load %arg4[%c4_237, %c2_238, %c0_239] : memref<5x32x128xf32, #tpu.memory_space<vmem>>, vector<1x16x128xf32>
    %375 = vector.shape_cast %374 : vector<1x16x128xf32> to vector<16x128xf32>
    %c4_240 = arith.constant 4 : index
    %c8_241 = arith.constant 8 : index
    %c0_242 = arith.constant 0 : index
    %376 = vector.load %arg4[%c4_240, %c8_241, %c0_242] : memref<5x32x128xf32, #tpu.memory_space<vmem>>, vector<1x16x128xf32>
    %377 = vector.shape_cast %376 : vector<1x16x128xf32> to vector<16x128xf32>
    %378 = arith.addf %375, %377 : vector<16x128xf32>
    %cst_243 = arith.constant 0.0360007733 : f32
    %379 = vector.broadcast %cst_243 : f32 to vector<16x128xf32>
    %380 = arith.mulf %379, %378 : vector<16x128xf32>
    %381 = arith.addf %373, %380 : vector<16x128xf32>
    %c4_244 = arith.constant 4 : index
    %c3_245 = arith.constant 3 : index
    %c0_246 = arith.constant 0 : index
    %382 = vector.load %arg4[%c4_244, %c3_245, %c0_246] : memref<5x32x128xf32, #tpu.memory_space<vmem>>, vector<1x16x128xf32>
    %383 = vector.shape_cast %382 : vector<1x16x128xf32> to vector<16x128xf32>
    %c4_247 = arith.constant 4 : index
    %c7_248 = arith.constant 7 : index
    %c0_249 = arith.constant 0 : index
    %384 = vector.load %arg4[%c4_247, %c7_248, %c0_249] : memref<5x32x128xf32, #tpu.memory_space<vmem>>, vector<1x16x128xf32>
    %385 = vector.shape_cast %384 : vector<1x16x128xf32> to vector<16x128xf32>
    %386 = arith.addf %383, %385 : vector<16x128xf32>
    %cst_250 = arith.constant 0.109360687 : f32
    %387 = vector.broadcast %cst_250 : f32 to vector<16x128xf32>
    %388 = arith.mulf %387, %386 : vector<16x128xf32>
    %389 = arith.addf %381, %388 : vector<16x128xf32>
    %c4_251 = arith.constant 4 : index
    %c4_252 = arith.constant 4 : index
    %c0_253 = arith.constant 0 : index
    %390 = vector.load %arg4[%c4_251, %c4_252, %c0_253] : memref<5x32x128xf32, #tpu.memory_space<vmem>>, vector<1x16x128xf32>
    %391 = vector.shape_cast %390 : vector<1x16x128xf32> to vector<16x128xf32>
    %c4_254 = arith.constant 4 : index
    %c6_255 = arith.constant 6 : index
    %c0_256 = arith.constant 0 : index
    %392 = vector.load %arg4[%c4_254, %c6_255, %c0_256] : memref<5x32x128xf32, #tpu.memory_space<vmem>>, vector<1x16x128xf32>
    %393 = vector.shape_cast %392 : vector<1x16x128xf32> to vector<16x128xf32>
    %394 = arith.addf %391, %393 : vector<16x128xf32>
    %cst_257 = arith.constant 0.213005543 : f32
    %395 = vector.broadcast %cst_257 : f32 to vector<16x128xf32>
    %396 = arith.mulf %395, %394 : vector<16x128xf32>
    %397 = arith.addf %389, %396 : vector<16x128xf32>
    %c123_i32_258 = arith.constant 123 : i32
    %398 = tpu.dynamic_rotate %397 by %c123_i32_258 dim 1 : vector<16x128xf32>, i32 -> vector<16x128xf32>
    %cst_259 = arith.constant 0.266011715 : f32
    %399 = vector.broadcast %cst_259 : f32 to vector<16x128xf32>
    %400 = arith.mulf %399, %398 : vector<16x128xf32>
    %c118_i32_260 = arith.constant 118 : i32
    %401 = tpu.dynamic_rotate %397 by %c118_i32_260 dim 1 : vector<16x128xf32>, i32 -> vector<16x128xf32>
    %402 = arith.addf %397, %401 : vector<16x128xf32>
    %cst_261 = arith.constant 0.00102838012 : f32
    %403 = vector.broadcast %cst_261 : f32 to vector<16x128xf32>
    %404 = arith.mulf %403, %402 : vector<16x128xf32>
    %405 = arith.addf %400, %404 : vector<16x128xf32>
    %c127_i32_262 = arith.constant 127 : i32
    %406 = tpu.dynamic_rotate %397 by %c127_i32_262 dim 1 : vector<16x128xf32>, i32 -> vector<16x128xf32>
    %c119_i32_263 = arith.constant 119 : i32
    %407 = tpu.dynamic_rotate %397 by %c119_i32_263 dim 1 : vector<16x128xf32>, i32 -> vector<16x128xf32>
    %408 = arith.addf %406, %407 : vector<16x128xf32>
    %cst_264 = arith.constant 0.00759875821 : f32
    %409 = vector.broadcast %cst_264 : f32 to vector<16x128xf32>
    %410 = arith.mulf %409, %408 : vector<16x128xf32>
    %411 = arith.addf %405, %410 : vector<16x128xf32>
    %c126_i32_265 = arith.constant 126 : i32
    %412 = tpu.dynamic_rotate %397 by %c126_i32_265 dim 1 : vector<16x128xf32>, i32 -> vector<16x128xf32>
    %c120_i32_266 = arith.constant 120 : i32
    %413 = tpu.dynamic_rotate %397 by %c120_i32_266 dim 1 : vector<16x128xf32>, i32 -> vector<16x128xf32>
    %414 = arith.addf %412, %413 : vector<16x128xf32>
    %cst_267 = arith.constant 0.0360007733 : f32
    %415 = vector.broadcast %cst_267 : f32 to vector<16x128xf32>
    %416 = arith.mulf %415, %414 : vector<16x128xf32>
    %417 = arith.addf %411, %416 : vector<16x128xf32>
    %c125_i32_268 = arith.constant 125 : i32
    %418 = tpu.dynamic_rotate %397 by %c125_i32_268 dim 1 : vector<16x128xf32>, i32 -> vector<16x128xf32>
    %c121_i32_269 = arith.constant 121 : i32
    %419 = tpu.dynamic_rotate %397 by %c121_i32_269 dim 1 : vector<16x128xf32>, i32 -> vector<16x128xf32>
    %420 = arith.addf %418, %419 : vector<16x128xf32>
    %cst_270 = arith.constant 0.109360687 : f32
    %421 = vector.broadcast %cst_270 : f32 to vector<16x128xf32>
    %422 = arith.mulf %421, %420 : vector<16x128xf32>
    %423 = arith.addf %417, %422 : vector<16x128xf32>
    %c124_i32_271 = arith.constant 124 : i32
    %424 = tpu.dynamic_rotate %397 by %c124_i32_271 dim 1 : vector<16x128xf32>, i32 -> vector<16x128xf32>
    %c122_i32_272 = arith.constant 122 : i32
    %425 = tpu.dynamic_rotate %397 by %c122_i32_272 dim 1 : vector<16x128xf32>, i32 -> vector<16x128xf32>
    %426 = arith.addf %424, %425 : vector<16x128xf32>
    %cst_273 = arith.constant 0.213005543 : f32
    %427 = vector.broadcast %cst_273 : f32 to vector<16x128xf32>
    %428 = arith.mulf %427, %426 : vector<16x128xf32>
    %429 = arith.addf %423, %428 : vector<16x128xf32>
    %430 = arith.mulf %125, %125 : vector<16x128xf32>
    %431 = arith.mulf %201, %201 : vector<16x128xf32>
    %432 = arith.mulf %125, %201 : vector<16x128xf32>
    %433 = arith.subf %277, %430 : vector<16x128xf32>
    %434 = arith.subf %353, %431 : vector<16x128xf32>
    %435 = arith.subf %429, %432 : vector<16x128xf32>
    %cst_274 = arith.constant 2.000000e+00 : f32
    %436 = vector.broadcast %cst_274 : f32 to vector<16x128xf32>
    %437 = arith.mulf %436, %432 : vector<16x128xf32>
    %cst_275 = arith.constant 9.99999974E-5 : f32
    %438 = vector.broadcast %cst_275 : f32 to vector<16x128xf32>
    %439 = arith.addf %437, %438 : vector<16x128xf32>
    %cst_276 = arith.constant 2.000000e+00 : f32
    %440 = vector.broadcast %cst_276 : f32 to vector<16x128xf32>
    %441 = arith.mulf %440, %435 : vector<16x128xf32>
    %cst_277 = arith.constant 8.99999984E-4 : f32
    %442 = vector.broadcast %cst_277 : f32 to vector<16x128xf32>
    %443 = arith.addf %441, %442 : vector<16x128xf32>
    %444 = arith.mulf %439, %443 : vector<16x128xf32>
    %445 = arith.addf %430, %431 : vector<16x128xf32>
    %cst_278 = arith.constant 9.99999974E-5 : f32
    %446 = vector.broadcast %cst_278 : f32 to vector<16x128xf32>
    %447 = arith.addf %445, %446 : vector<16x128xf32>
    %448 = arith.addf %433, %434 : vector<16x128xf32>
    %cst_279 = arith.constant 8.99999984E-4 : f32
    %449 = vector.broadcast %cst_279 : f32 to vector<16x128xf32>
    %450 = arith.addf %448, %449 : vector<16x128xf32>
    %451 = arith.mulf %447, %450 : vector<16x128xf32>
    %452 = tpu.reciprocal %451 {approx = true} : vector<16x128xf32> -> vector<16x128xf32>
    %453 = arith.mulf %451, %452 : vector<16x128xf32>
    %cst_280 = arith.constant 2.000000e+00 : f32
    %454 = vector.broadcast %cst_280 : f32 to vector<16x128xf32>
    %455 = arith.subf %454, %453 : vector<16x128xf32>
    %456 = arith.mulf %452, %455 : vector<16x128xf32>
    %457 = arith.mulf %444, %456 : vector<16x128xf32>
    %cst_281 = arith.constant 0.000000e+00 : f32
    %458 = vector.shape_cast %24 : vector<1x128xi1> to vector<1x128xi1>
    %459 = vector.broadcast %458 : vector<1x128xi1> to vector<16x128xi1>
    %460 = vector.broadcast %cst_281 : f32 to vector<16x128xf32>
    %461 = arith.select %459, %457, %460 : vector<16x128xi1>, vector<16x128xf32>
    %cst_282 = arith.constant dense<0.000000e+00> : vector<128xf32>
    %462 = vector.multi_reduction <add>, %461, %cst_282 [0] : vector<16x128xf32> to vector<128xf32>
    %463 = vector.shape_cast %462 : vector<128xf32> to vector<1x128xf32>
    %464 = vector.broadcast %c0_i32_0 : i32 to vector<8x128xi32>
    %465 = arith.cmpi eq, %0, %464 : vector<8x128xi32>
    %466 = vector.shape_cast %463 : vector<1x128xf32> to vector<1x128xf32>
    %467 = vector.broadcast %466 : vector<1x128xf32> to vector<8x128xf32>
    %468 = arith.select %465, %467, %25 : vector<8x128xi1>, vector<8x128xf32>
    %c1_i32 = arith.constant 1 : i32
    %c0_283 = arith.constant 0 : index
    %c0_284 = arith.constant 0 : index
    %c0_285 = arith.constant 0 : index
    %469 = vector.load %arg3[%c0_283, %c0_284, %c0_285] : memref<1x8x128xf32, #tpu.memory_space<vmem>>, vector<1x8x128xf32>
    %470 = vector.shape_cast %469 : vector<1x8x128xf32> to vector<8x128xf32>
    %471 = vector.shape_cast %468 : vector<8x128xf32> to vector<1x8x128xf32>
    tpu.vector_store %arg3[%c0_283, %c0_284, %c0_285], %471 {strides = array<i32>} : memref<1x8x128xf32, #tpu.memory_space<vmem>>, vector<1x8x128xf32>,
    return
  }
  func.func @transform_0(%arg0: i32) -> (i32, i32, i32) {
    %c0_i32 = arith.constant 0 : i32
    %c0_i32_0 = arith.constant 0 : i32
    %c0_i32_1 = arith.constant 0 : i32
    return %arg0, %c0_i32, %c0_i32_0 : i32, i32, i32
  }
  func.func @transform_1(%arg0: i32) -> (i32, i32, i32) {
    %c0_i32 = arith.constant 0 : i32
    %c0_i32_0 = arith.constant 0 : i32
    %c0_i32_1 = arith.constant 0 : i32
    return %arg0, %c0_i32, %c0_i32_0 : i32, i32, i32
  }
  func.func @transform_2(%arg0: i32) -> (i32, i32, i32) {
    %c0_i32 = arith.constant 0 : i32
    %c0_i32_0 = arith.constant 0 : i32
    %c0_i32_1 = arith.constant 0 : i32
    return %arg0, %c0_i32, %c0_i32_0 : i32, i32, i32
  }
}

</mosaic_0001>

<bundles_post_ra>
// kernel: tpu_custom_call.1
= control target key start
LH: loop header
LB: loop body
LE: loop exit
PB: predicated region body
PF: predicated region fallthrough
CT: control target
= control target key end

     0   :  { %7 = vsyncpa [#allocation4], 0  ;;  %s1913_s0 = inlined_call_operand.hbm [shape: f32[2,32,128], index: 0, kind: input, shape index: {}]   ;;  %s1914_s1 = inlined_call_operand.hbm [shape: f32[2,32,128], index: 1, kind: input, shape index: {}]   ;;  %s1915_s2 = inlined_call_operand.hbm [shape: f32[2,8,128], index: 2, kind: output, shape index: {}]  }
   0x1   :  { %9 = vsyncpa [#allocation4 + $0x1], 0 }
   0x2   :  { %10 = vsyncpa [#allocation7], 0 }
   0x3   :  { %12 = vsyncpa [#allocation7 + $0x1], 0 }
   0x4   :  { %13 = vsyncpa [#allocation5], 0 }
   0x5   :  { %15 = vsyncpa [#allocation5 + $0x1], 0  ;;  %s1293_s9 = smov 0   ;;  %s1295_s10 = smov 0  }
   0x6   :  { %s1297_s11 = smov 0   ;;  %s1299_s12 = smov 0  }
   0x7 LB: > { %s1314_s13 = sadd.s32 4294967295, %s1260_s12   ;;  %s1043_s14 = sadd.s32 4294967294, %s1260_s12   ;;  %s1260_s12 = sphi %s1299_s12, %s1935_s12   ;;  %s1256_s11 = sphi %s1297_s11, %s1934_s11   ;;  %s1252_s10 = sphi %s1295_s10, %s1933_s10   ;;  %s1248_s9 = sphi %s1293_s9, %s1932_s9  }
   0x8   : > { %s1318_s15 = sadd.s32 1, %s1260_s12   ;;  %s28_s16 = sadd.s32 1, %s1256_s11 }
   0x9   : > { %s25_s17 = ssub.s32 %s1260_s12, %s1318_s15  ;;  %p35_p0 = scmp.ne.s32.totalorder %s1256_s11, %s1252_s10 }
   0xa   : > { %p26_p1 = scmp.eq.s32.totalorder %s25_s17, 0  ;;  %p36_p2 = scmp.eq.s32.totalorder %s1260_s12, 0 }
   0xb   : > { %p41_p3 = scmp.ne.s32.totalorder %s1252_s10, %s1248_s9  ;;  %p42_p4 = scmp.eq.s32.totalorder %s1314_s13, 0 }
   0xc   : > { %s1330_s18 = scalar_select %p26_p1, %s1256_s11, %s28_s16  }
   0xd   : > { %p1332_p5 = por %p36_p2, %p35_p0  ;;  %p1336_p6 = por %p42_p4, %p41_p3 }
   0xe   : > { %p91_p7 = scmp.eq.s32.totalorder %s1314_s13, 1  ;;  %p97_p8 = scmp.eq.s32.totalorder %s1043_s14, 1 }
   0xf   : > { %s1919_s20 = scalar_select %p1336_p6, 1, 0 }
  0x10   : > { %p1079_p10 = scmp.lt.s32.totalorder %s1260_s12, 2  ;;  %p1343_p11 = por %p91_p7, %p35_p0 }
  0x11   : > { %p1347_p12 = por %p97_p8, %p41_p3  ;;  %s1352_s23 = sand.u32 1, %s1256_s11  }
  0x12   : > { %s1920_s21 = scalar_select %p1343_p11, 1, 0 }
  0x13   : > { %s1921_s22 = scalar_select %p1347_p12, 1, 0 }
  0x14   : > { %s1060_s24 = sshll.u32 %s1260_s12, 9  ;;  %s1046_s25 = sshll.u32 %s1352_s23, 5 }
  0x15   : > { %s1361_s28 = scalar_lea.hbm %s1913_s0, %s1060_s24  ;;  %s121_s29 = scalar_lea.vmem [#allocation3], %s1046_s25 }
  0x16   : > { %s128_s30 = sshll.u32 %s121_s29, 4  ;;  %p1367_p13 = pnand %p1079_p10, %p1332_p5  ;;  %s1371_s30 = int_to_ptr.vmem [resolvable:$true] %s128_s30 }
  0x17   : > { %s118_s4 = scalar_lea.sflag [#allocation4], %s1352_s23  ;;  %s1130_s5 = scalar_lea.hbm %s1361_s28, 512 }
  0x18   : > { %p1131_p0 = scmp.ne.s32.totalorder %s1361_s28, %s1130_s5  ;;  %p1132_p1 = pneg %p1367_p13 }
  0x19   : > { %s1135_s8 = scalar_lea.hbm %s1913_s0, 1024  ;;  %p1136_p4 = scmp.lt.u32.totalorder %s1361_s28, %s1913_s0 }
  0x1a   : > { %p1133_p2 = pnand %p1132_p1, %p1131_p0  ;;  %p1137_p5 = scmp.lt.u32.totalorder %s1135_s8, %s1130_s5 }
  0x1b   : > { %p1139_p8 = scmp.lt.u32.totalorder %s1130_s5, %s1361_s28 }
  0x1c   : > { %p1134_p3 = pneg %p1133_p2  ;;  %p1138_p7 = por %p1137_p5, %p1136_p4 }
  0x1e   : > { %p1140_p10 = por %p1139_p8, %p1138_p7 }
  0x20   : > { %p1141_p9 = pnand %p1140_p10, %p1134_p3 }
  0x22   : > { %1144 = shalt.err (!%p1141_p9)
}
  0x23   : > { %s1145_s17 = scalar_lea.vmem %s1371_s30, 512  ;;  %s1262_s19 = smov [#allocation3]  }
  0x24   : > { %p1146_p0 = scmp.ne.s32.totalorder %s1371_s30, %s1145_s17  ;;  %s1150_s26 = sshll.u32 %s1262_s19, 4  ;;  %s1151_s26 = int_to_ptr.vmem [resolvable:$false] %s1150_s26 }
  0x25   : > { %s1152_s27 = scalar_lea.vmem %s1151_s26, 1024  ;;  %p1153_p11 = scmp.lt.s32.totalorder %s1371_s30, %s1151_s26 }
  0x26   : > { %p1148_p2 = pnand %p1146_p0, %p1132_p1  ;;  %p1154_p4 = scmp.lt.s32.totalorder %s1152_s27, %s1145_s17 }
  0x28   : > { %p1149_p12 = pneg %p1148_p2  ;;  %p1155_p5 = por %p1154_p4, %p1153_p11 }
  0x2a   : > { %p1156_p7 = pnand %p1155_p5, %p1149_p12 }
  0x2c   : > { %1159 = shalt.err (!%p1156_p7)
}
  0x2d   : > { %s1263_s29 = smov 128   ;;  %s1264_s5 = smov 8  }
  0x2e   : > { %1071 = dma.hbm_to_vmem [thread:$0]  (!%p1367_p13), %s1361_s28, 512, %s1371_s30, %s118_s4, %s1263_s29, %s1263_s29, %s1264_s5  }
  0x2f   : > { %p1052_p9 = scmp.ge.s32.totalorder %s1260_s12, 1  ;;  %p157_p11 = scmp.lt.s32.totalorder %s1260_s12, 3 }
  0x30   : > { %s1415_s14 = scalar_lea.hbm %s1914_s1, %s1060_s24  ;;  %s142_s16 = scalar_lea.vmem [#allocation6], %s1046_s25 }
  0x31   : > { %p1406_p12 = pnand %p1052_p9, %p157_p11  ;;  %s149_s17 = sshll.u32 %s142_s16, 4  ;;  %s1419_s17 = int_to_ptr.vmem [resolvable:$true] %s149_s17 }
  0x32   : > { %s139_s28 = scalar_lea.sflag [#allocation7], %s1352_s23  ;;  %s1160_s30 = scalar_lea.hbm %s1415_s14, 512 }
  0x33   : > { %p1161_p3 = scmp.ne.s32.totalorder %s1415_s14, %s1160_s30  ;;  %s1165_s24 = scalar_lea.hbm %s1914_s1, 1024 }
  0x34   : > { %p1166_p0 = scmp.lt.u32.totalorder %s1415_s14, %s1914_s1  ;;  %p1167_p2 = scmp.lt.u32.totalorder %s1165_s24, %s1160_s30 }
  0x35   : > { %p1163_p8 = pnand %p1161_p3, %p1132_p1  ;;  %p1169_p5 = scmp.lt.u32.totalorder %s1160_s30, %s1415_s14 }
  0x36   : > { %p1168_p4 = por %p1167_p2, %p1166_p0 }
  0x37   : > { %p1164_p10 = pneg %p1163_p8 }
  0x38   : > { %p1170_p7 = por %p1169_p5, %p1168_p4 }
  0x3a   : > { %p1171_p9 = pnand %p1170_p7, %p1164_p10 }
  0x3c   : > { %1174 = shalt.err (!%p1171_p9)
}
  0x3d   : > { %s1175_s25 = scalar_lea.vmem %s1419_s17, 512  ;;  %s1265_s7 = smov [#allocation6]  }
  0x3e   : > { %p1176_p11 = scmp.ne.s32.totalorder %s1419_s17, %s1175_s25  ;;  %s1180_s8 = sshll.u32 %s1265_s7, 4  ;;  %s1181_s8 = int_to_ptr.vmem [resolvable:$false] %s1180_s8 }
  0x3f   : > { %s1182_s16 = scalar_lea.vmem %s1181_s8, 1024  ;;  %p1183_p6 = scmp.lt.s32.totalorder %s1419_s17, %s1181_s8 }
  0x40   : > { %p1178_p3 = pnand %p1176_p11, %p1132_p1  ;;  %p1184_p0 = scmp.lt.s32.totalorder %s1182_s16, %s1175_s25 }
  0x42   : > { %p1179_p8 = pneg %p1178_p3  ;;  %p1185_p2 = por %p1184_p0, %p1183_p6 }
  0x44   : > { %p1186_p4 = pnand %p1185_p2, %p1179_p8 }
  0x46   : > { %1189 = shalt.err (!%p1186_p4)
}
  0x47   : > { %1074 = dma.hbm_to_vmem [thread:$0]  (!%p1367_p13), %s1415_s14, 512, %s1419_s17, %s139_s28, %s1263_s29, %s1263_s29, %s1264_s5  }
  0x48   : > { %161 = sbr.rel (%p1406_p12) target bundleno = 463 (0x1cf), region = 28  ;;  %s1453_s30 = sand.u32 (!%p1406_p12), 1, %s1252_s10  }
  0x49   : > { %s1053_s4 = sshll.u32 (!%p1406_p12), %s1453_s30, 5  ;;  %s164_s19 = scalar_lea.sflag (!%p1406_p12), [#allocation4], %s1453_s30 }
  0x4a   : > { %s167_s3 = scalar_lea.vmem (!%p1406_p12), [#allocation3], %s1053_s4  ;;  %p1924_p6 = scmp.ne.s32.totalorder (!%p1406_p12), %s1919_s20, 0 }
  0x4f   : > { %1235 = dma.done.wait (%p1924_p6), %s164_s19, 512  }
  0x50   : > { %1237 = vsyncadd (%p1924_p6), %s164_s19, 4294966784  ;;  %s173_s23 = scalar_lea.sflag [#allocation7], %s1453_s30  ;;  %s176_s29 = scalar_lea.vmem [#allocation6], %s1053_s4 }
  0x51   : > { %1239 = dma.done.wait (%p1924_p6), %s173_s23, 512  }
  0x52   : > { %1241 = vsyncadd (%p1924_p6), %s173_s23, 4294966784  ;;  %v1466_v0 = vld [vmem:[%s167_s3] sm:$0xff]  ;;  %v1468_v1 = vld [vmem:[%s167_s3 + $0x8] sm:$0xff]  ;;  %s1266_s20 = smov 118   ;;  %s1267_s5 = smov 123  }
  0x53   : > { %v1470_v2 = vld [vmem:[%s167_s3 + $0x10] sm:$0xff]  ;;  %v1472_v3 = vld [vmem:[%s167_s3 + $0x18] sm:$0xff]  ;;  %229 = vst [vmem:[#allocation2] sm:$0xff] %v1466_v0  ;;  %230 = vst [vmem:[#allocation2 + $0x8] sm:$0xff] %v1468_v1  ;;  %v1483_v6 = vmul.f32 %v1466_v0, %v1466_v0  ;;  %v1487_v7 = vmul.f32 %v1468_v1, %v1468_v1  ;;  %s1268_s6 = smov 127   ;;  %s1269_s14 = smov 119  }
  0x54   : > { %231 = vst [vmem:[#allocation2 + $0x10] sm:$0xff] %v1470_v2  ;;  %v1477_v4 = vld [vmem:[%s176_s29] sm:$0xff]  ;;  %v1479_v5 = vld [vmem:[%s176_s29 + $0x8] sm:$0xff]  ;;  %v1491_v8 = vmul.f32 %v1470_v2, %v1470_v2  ;;  %232 = vst [vmem:[#allocation2 + $0x18] sm:$0xff] %v1472_v3  ;;  %v241_v11 = vmul.f32 %v1472_v3, %v1472_v3  ;;  %s1270_s17 = smov 126   ;;  %s1271_s28 = smov 120  }
  0x55   : > { %v1494_v9 = vld [vmem:[%s176_s29 + $0x10] sm:$0xff]  ;;  %v1496_v10 = vld [vmem:[%s176_s29 + $0x18] sm:$0xff]  ;;  %234 = vst [vmem:[#allocation2 + $0x20] sm:$0xff] %v1477_v4  ;;  %235 = vst [vmem:[#allocation2 + $0x28] sm:$0xff] %v1479_v5  ;;  %v1504_v12 = vmul.f32 %v1477_v4, %v1477_v4  ;;  %v1508_v13 = vmul.f32 %v1479_v5, %v1479_v5  ;;  %s1272_s24 = smov 125   ;;  %s1273_s26 = smov 121  }
  0x56   : > { %236 = vst [vmem:[#allocation2 + $0x30] sm:$0xff] %v1494_v9  ;;  %237 = vst [vmem:[#allocation2 + $0x38] sm:$0xff] %v1496_v10  ;;  %v1517_v14 = vmul.f32 %v1494_v9, %v1494_v9  ;;  %v250_v15 = vmul.f32 %v1496_v10, %v1496_v10  ;;  %s1274_s27 = smov 124   ;;  %s1275_s25 = smov 122  }
  0x57   : > { %243 = vst [vmem:[#allocation2 + $0x40] sm:$0xff] %v1483_v6  ;;  %244 = vst [vmem:[#allocation2 + $0x48] sm:$0xff] %v1487_v7  ;;  %s1055_s7 = sshll.u32 %s1453_s30, 3  ;;  %s1057_s8 = sshll.u32 %s1314_s13, 7 }
  0x58   : > { %245 = vst [vmem:[#allocation2 + $0x50] sm:$0xff] %v1491_v8  ;;  %246 = vst [vmem:[#allocation2 + $0x58] sm:$0xff] %v241_v11  ;;  %s201_s16 = scalar_lea.vmem [#allocation8], %s1055_s7  ;;  %s1869_s23 = scalar_lea.hbm %s1915_s2, %s1057_s8 }
  0x59   : > { %252 = vst [vmem:[#allocation2 + $0x60] sm:$0xff] %v1504_v12  ;;  %253 = vst [vmem:[#allocation2 + $0x68] sm:$0xff] %v1508_v13  ;;  %s950_s4 = sshll.u32 %s201_s16, 4  ;;  %s937_s29 = scalar_lea.sflag [#allocation5], %s1453_s30  ;;  %s1871_s4 = int_to_ptr.vmem [resolvable:$true] %s950_s4 }
  0x5a   : > { %254 = vst [vmem:[#allocation2 + $0x70] sm:$0xff] %v1517_v14  ;;  %255 = vst [vmem:[#allocation2 + $0x78] sm:$0xff] %v250_v15  ;;  %v265_v16 = vld [vmem:[#allocation2 + $0x5] sm:$0xff]  ;;  %p1929_p1 = scmp.ne.s32.totalorder %s1920_s21, 0  ;;  %s1277_s13 = smov [#allocation8]  }
  0x5b   : > { %v271_v17 = vld [vmem:[#allocation2 + $0xa] sm:$0xff]  ;;  %v279_v18 = vld [vmem:[#allocation2 + $0x1] sm:$0xff]  ;;  %v267_v19 = vmul.f32 0.26601171, %v265_v16  ;;  %v272_v20 = vld [vmem:[#allocation2 + $0x12] sm:$0xff] }
  0x5c   : > { %v273_v21 = vadd.f32 %v271_v17, %v1466_v0  ;;  %v280_v22 = vld [vmem:[#allocation2 + $0x9] sm:$0xff]  ;;  %v274_v24 = vadd.f32 %v272_v20, %v1468_v1  ;;  %v291_v30 = vadd.f32 %v271_v17, %v1470_v2  ;;  %v281_v35 = vld [vmem:[#allocation2 + $0x11] sm:$0xff] }
  0x5d   : > { %v288_v23 = vld [vmem:[#allocation2 + $0x2] sm:$0xff]  ;;  %v282_v25 = vadd.f32 %v280_v22, %v279_v18  ;;  %v266_v34 = vld [vmem:[#allocation2 + $0xd] sm:$0xff]  ;;  %v283_v42 = vadd.f32 %v281_v35, %v280_v22 }
  0x5e   : > { %v290_v26 = vadd.f32 %v288_v23, %v1468_v1  ;;  %v296_v27 = vld [vmem:[#allocation2 + $0x3] sm:$0xff]  ;;  %v275_v31 = vmul.f32 0.0010283801, %v273_v21  ;;  %v276_v36 = vmul.f32 0.0010283801, %v274_v24  ;;  %v297_v43 = vld [vmem:[#allocation2 + $0xb] sm:$0xff] }
  0x5f   : > { %v298_v28 = vld [vmem:[#allocation2 + $0x7] sm:$0xff]  ;;  %v284_v37 = vmul.f32 0.007598758, %v282_v25  ;;  %v268_v41 = vmul.f32 0.26601171, %v266_v34  ;;  %v299_v44 = vld [vmem:[#allocation2 + $0xf] sm:$0xff] }
  0x60   : > { %v306_v29 = vld [vmem:[#allocation2 + $0x4] sm:$0xff]  ;;  %v300_v32 = vadd.f32 %v298_v28, %v296_v27  ;;  %v292_v38 = vmul.f32 0.036000773, %v290_v26  ;;  %v277_v39 = vadd.f32 %v275_v31, %v267_v19  ;;  %v293_v46 = vmul.f32 0.036000773, %v291_v30  ;;  %v307_v48 = vld [vmem:[#allocation2 + $0xc] sm:$0xff] }
  0x61   : > { %v308_v33 = vld [vmem:[#allocation2 + $0x6] sm:$0xff]  ;;  %v301_v47 = vadd.f32 %v299_v44, %v297_v43  ;;  %v309_v49 = vld [vmem:[#allocation2 + $0xe] sm:$0xff]  ;;  %v278_v51 = vadd.f32 %v276_v36, %v268_v41  ;;  %v285_v52 = vmul.f32 0.007598758, %v283_v42 }
  0x62   : > { %v310_v40 = vadd.f32 %v308_v33, %v306_v29  ;;  %v302_v45 = vmul.f32 0.10936069, %v300_v32  ;;  %v286_v50 = vadd.f32 %v284_v37, %v277_v39  ;;  %v311_v53 = vadd.f32 %v309_v49, %v307_v48  ;;  %v512_v63 = vld [vmem:[#allocation2 + $0x4d] sm:$0xff]  ;;  %v511_v23 = vld [vmem:[#allocation2 + $0x45] sm:$0xff] }
  0x63   : > { %v287_v56 = vadd.f32 %v285_v52, %v278_v51  ;;  %v303_v57 = vmul.f32 0.10936069, %v301_v47  ;;  %v517_v11 = vld [vmem:[#allocation2 + $0x4a] sm:$0xff]  ;;  %v518_v15 = vld [vmem:[#allocation2 + $0x52] sm:$0xff]  ;;  %v514_v20 = vmul.f32 0.26601171, %v512_v63 }
  0x64   : > { %v294_v54 = vadd.f32 %v292_v38, %v286_v50  ;;  %v312_v55 = vmul.f32 0.21300554, %v310_v40  ;;  %v313_v60 = vmul.f32 0.21300554, %v311_v53  ;;  %v526_v17 = vld [vmem:[#allocation2 + $0x49] sm:$0xff]  ;;  %v527_v18 = vld [vmem:[#allocation2 + $0x51] sm:$0xff]  ;;  %v519_v19 = vadd.f32 %v517_v11, %v1483_v6 }
  0x65   : > { %v295_v59 = vadd.f32 %v293_v46, %v287_v56  ;;  %v520_v21 = vadd.f32 %v518_v15, %v1487_v7  ;;  %v529_v22 = vadd.f32 %v527_v18, %v526_v17  ;;  %v537_v25 = vadd.f32 %v517_v11, %v1491_v8  ;;  %v525_v26 = vld [vmem:[#allocation2 + $0x41] sm:$0xff]  ;;  %v635_v33 = vld [vmem:[#allocation2 + $0x6d] sm:$0xff] }
  0x66   : > { %v304_v58 = vadd.f32 %v302_v45, %v294_v54  ;;  %v521_v24 = vmul.f32 0.0010283801, %v519_v19  ;;  %v534_v29 = vld [vmem:[#allocation2 + $0x42] sm:$0xff]  ;;  %v513_v30 = vmul.f32 0.26601171, %v511_v23  ;;  %v528_v32 = vadd.f32 %v526_v17, %v525_v26  ;;  %v640_v34 = vld [vmem:[#allocation2 + $0x6a] sm:$0xff] }
  0x67   : > { %v305_v62 = vadd.f32 %v303_v57, %v295_v59  ;;  %v522_v27 = vmul.f32 0.0010283801, %v520_v21  ;;  %v531_v28 = vmul.f32 0.007598758, %v529_v22  ;;  %v539_v31 = vmul.f32 0.036000773, %v537_v25 }
  0x68   : > { %v1528_v61 = vadd.f32 %v312_v55, %v304_v58  ;;  %v523_v35 = vadd.f32 %v521_v24, %v513_v30  ;;  %v536_v36 = vadd.f32 %v534_v29, %v1487_v7  ;;  %v641_v8 = vld [vmem:[#allocation2 + $0x72] sm:$0xff]  ;;  %v649_v37 = vld [vmem:[#allocation2 + $0x69] sm:$0xff]  ;;  %v530_v42 = vmul.f32 0.007598758, %v528_v32  ;;  %v648_v57 = vld [vmem:[#allocation2 + $0x61] sm:$0xff] }
  0x69   : > { %v1534_v16 = vadd.f32 %v313_v60, %v305_v62  ;;  %v524_v6 = vadd.f32 %v522_v27, %v514_v20  ;;  %v650_v38 = vld [vmem:[#allocation2 + $0x71] sm:$0xff]  ;;  %v637_v44 = vmul.f32 0.26601171, %v635_v33  ;;  %v642_v45 = vadd.f32 %v640_v34, %v1504_v12  ;;  %v403_v7 = vld [vmem:[#allocation2 + $0x29] sm:$0xff]  ;;  %v402_v11 = vld [vmem:[#allocation2 + $0x21] sm:$0xff] }
  0x6a   : > { %322 = vrot.lane.b32.xlu1 %v1528_v61, %s1266_s20  ;;  %316 = vrot.lane.b32.xlu0 %v1528_v61, %s1267_s5  ;;  %v394_v39 = vld [vmem:[#allocation2 + $0x2a] sm:$0xff]  ;;  %v395_v40 = vld [vmem:[#allocation2 + $0x32] sm:$0xff]  ;;  %v538_v43 = vmul.f32 0.036000773, %v536_v36  ;;  %v532_v48 = vadd.f32 %v530_v42, %v523_v35  ;;  %v643_v49 = vadd.f32 %v641_v8, %v1508_v13  ;;  %v652_v50 = vadd.f32 %v650_v38, %v649_v37  ;;  %v657_v60 = vld [vmem:[#allocation2 + $0x62] sm:$0xff] }
  0x6b   : > { %v533_v41 = vadd.f32 %v531_v28, %v524_v6  ;;  %v389_v46 = vld [vmem:[#allocation2 + $0x2d] sm:$0xff]  ;;  %v396_v51 = vadd.f32 %v394_v39, %v1477_v4  ;;  %v397_v52 = vadd.f32 %v395_v40, %v1479_v5  ;;  %v644_v54 = vmul.f32 0.0010283801, %v642_v45  ;;  %v634_v56 = vld [vmem:[#allocation2 + $0x65] sm:$0xff] }
  0x6c   : > { %v404_v53 = vld [vmem:[#allocation2 + $0x31] sm:$0xff]  ;;  %v660_v55 = vadd.f32 %v640_v34, %v1517_v14  ;;  %v1559_v12 = vadd.f32 %v538_v43, %v532_v48  ;;  %v645_v58 = vmul.f32 0.0010283801, %v643_v49  ;;  %v654_v59 = vmul.f32 0.007598758, %v652_v50  ;;  %v388_v63 = vld [vmem:[#allocation2 + $0x25] sm:$0xff] }
  0x6d   : > { %v1549_v47 = vadd.f32 %v539_v31, %v533_v41  ;;  %v391_v62 = vmul.f32 0.26601171, %v389_v46  ;;  %v651_v15 = vadd.f32 %v649_v37, %v648_v57  ;;  %v406_v17 = vadd.f32 %v404_v53, %v403_v7  ;;  %v411_v28 = vld [vmem:[#allocation2 + $0x22] sm:$0xff]  ;;  %v430_v40 = vld [vmem:[#allocation2 + $0x2c] sm:$0xff] }
  0x6e   : > { %324 = vrot.lane.b32.xlu1 %v1534_v16, %s1266_s20  ;;  %318 = vrot.lane.b32.xlu0 %v1534_v16, %s1267_s5  ;;  %v647_v14 = vadd.f32 %v645_v58, %v637_v44  ;;  %v662_v18 = vmul.f32 0.036000773, %v660_v55  ;;  %v636_v19 = vmul.f32 0.26601171, %v634_v56  ;;  %v398_v20 = vmul.f32 0.0010283801, %v396_v51 }
  0x6f   : > { %v399_v21 = vmul.f32 0.0010283801, %v397_v52  ;;  %v653_v22 = vmul.f32 0.007598758, %v651_v15  ;;  %v659_v23 = vadd.f32 %v657_v60, %v1508_v13  ;;  %v390_v24 = vmul.f32 0.26601171, %v388_v63 }
  0x70   : > { %v405_v25 = vadd.f32 %v403_v7, %v402_v11  ;;  %v656_v26 = vadd.f32 %v654_v59, %v647_v14  ;;  %v646_v27 = vadd.f32 %v644_v54, %v636_v19  ;;  %v256_v30 = vmul.f32 %v1477_v4, %v1466_v0  ;;  %v420_v0 = vld [vmem:[#allocation2 + $0x2b] sm:$0xff] }
  0x71   : > { %v661_v29 = vmul.f32 0.036000773, %v659_v23  ;;  %v1572_v13 = vmul.f32 %v1479_v5, %v1468_v1  ;;  %v258_v32 = vmul.f32 %v1494_v9, %v1470_v2  ;;  %v401_v33 = vadd.f32 %v399_v21, %v391_v62  ;;  %v422_v1 = vld [vmem:[#allocation2 + $0x2f] sm:$0xff]  ;;  %v429_v44 = vld [vmem:[#allocation2 + $0x24] sm:$0xff] }
  0x72   : > { %334 = vrot.lane.b32.xlu1 %v1534_v16, %s1268_s6  ;;  %332 = vrot.lane.b32.xlu0 %v1528_v61, %s1268_s6  ;;  %v1568_v6 = vadd.f32 %v662_v18, %v656_v26  ;;  %v655_v31 = vadd.f32 %v653_v22, %v646_v27  ;;  %v408_v34 = vmul.f32 0.007598758, %v406_v17  ;;  %v414_v35 = vadd.f32 %v394_v39, %v1494_v9  ;;  %v421_v9 = vld [vmem:[#allocation2 + $0x27] sm:$0xff] }
  0x73   : > { %v259_v36 = vmul.f32 %v1496_v10, %v1472_v3  ;;  %261 = vst [vmem:[#allocation2 + $0x80] sm:$0xff] %v256_v30  ;;  %v400_v4 = vadd.f32 %v398_v20, %v390_v24  ;;  %v407_v8 = vmul.f32 0.007598758, %v405_v25  ;;  %v413_v2 = vadd.f32 %v411_v28, %v1479_v5  ;;  %262 = vst [vmem:[#allocation2 + $0x88] sm:$0xff] %v1572_v13  ;;  %v419_v3 = vld [vmem:[#allocation2 + $0x23] sm:$0xff]  ;;  %v432_v41 = vld [vmem:[#allocation2 + $0x2e] sm:$0xff] }
  0x74   : > { %v1584_v37 = vadd.f32 %v661_v29, %v655_v31  ;;  %263 = vst [vmem:[#allocation2 + $0x90] sm:$0xff] %v258_v32  ;;  %v410_v10 = vadd.f32 %v408_v34, %v401_v33  ;;  %v416_v38 = vmul.f32 0.036000773, %v414_v35  ;;  %v424_v39 = vadd.f32 %v422_v1, %v420_v0  ;;  %v431_v45 = vld [vmem:[#allocation2 + $0x26] sm:$0xff]  ;;  %v545_v0 = vld [vmem:[#allocation2 + $0x4f] sm:$0xff] }
  0x75   : > { %264 = vst [vmem:[#allocation2 + $0x98] sm:$0xff] %v259_v36  ;;  %v409_v5 = vadd.f32 %v407_v8, %v400_v4  ;;  %v415_v42 = vmul.f32 0.036000773, %v413_v2  ;;  %v423_v43 = vadd.f32 %v421_v9, %v419_v3  ;;  %v434_v46 = vadd.f32 %v432_v41, %v430_v40  ;;  %v542_v1 = vld [vmem:[#allocation2 + $0x43] sm:$0xff]  ;;  %v553_v2 = vld [vmem:[#allocation2 + $0x4c] sm:$0xff] }
  0x76   : > { %338 = vrot.lane.b32.xlu1 %v1534_v16, %s1269_s14  ;;  %336 = vrot.lane.b32.xlu0 %v1528_v61, %s1269_s14  ;;  %v418_v7 = vadd.f32 %v416_v38, %v410_v10  ;;  %v426_v48 = vmul.f32 0.10936069, %v424_v39  ;;  %v433_v49 = vadd.f32 %v431_v45, %v429_v44  ;;  %v544_v4 = vld [vmem:[#allocation2 + $0x47] sm:$0xff] }
  0x77   : > { %v417_v53 = vadd.f32 %v415_v42, %v409_v5  ;;  %v425_v54 = vmul.f32 0.10936069, %v423_v43  ;;  %v436_v63 = vmul.f32 0.21300554, %v434_v46  ;;  %v555_v3 = vld [vmem:[#allocation2 + $0x4e] sm:$0xff]  ;;  %v546_v9 = vadd.f32 %v544_v4, %v542_v1  ;;  %v552_v10 = vld [vmem:[#allocation2 + $0x44] sm:$0xff] }
  0x78   : > { %v428_v21 = vadd.f32 %v426_v48, %v418_v7  ;;  %v435_v23 = vmul.f32 0.21300554, %v433_v49  ;;  %v554_v38 = vld [vmem:[#allocation2 + $0x46] sm:$0xff]  ;;  %v557_v39 = vadd.f32 %v555_v3, %v553_v2  ;;  %v668_v43 = vld [vmem:[#allocation2 + $0x6f] sm:$0xff] }
  0x79   : > { %v427_v22 = vadd.f32 %v425_v54, %v417_v53  ;;  %v548_v41 = vmul.f32 0.10936069, %v546_v9  ;;  %v556_v5 = vadd.f32 %v554_v38, %v552_v10  ;;  %v666_v42 = vld [vmem:[#allocation2 + $0x6b] sm:$0xff]  ;;  %v665_v44 = vld [vmem:[#allocation2 + $0x63] sm:$0xff] }
  0x7a   : > { %348 = vrot.lane.b32.xlu1 %v1534_v16, %s1270_s17  ;;  %346 = vrot.lane.b32.xlu0 %v1528_v61, %s1270_s17  ;;  %v757_v15 = vld [vmem:[#allocation2 + $0x85] sm:$0xff]  ;;  %v1605_v33 = vadd.f32 %v436_v63, %v428_v21  ;;  %v559_v46 = vmul.f32 0.21300554, %v557_v39  ;;  %v670_v7 = vadd.f32 %v668_v43, %v666_v42 }
  0x7b   : > { %v758_v50 = vld [vmem:[#allocation2 + $0x8d] sm:$0xff]  ;;  %v771_v17 = vld [vmem:[#allocation2 + $0x81] sm:$0xff]  ;;  %v759_v19 = vmul.f32 0.26601171, %v757_v15  ;;  %v1607_v34 = vadd.f32 %v435_v23, %v427_v22  ;;  %v550_v49 = vadd.f32 %v548_v41, %v1559_v12 }
  0x7c   : > { %v763_v51 = vld [vmem:[#allocation2 + $0x8a] sm:$0xff]  ;;  %v764_v55 = vld [vmem:[#allocation2 + $0x92] sm:$0xff]  ;;  %v760_v59 = vmul.f32 0.26601171, %v758_v50  ;;  %v780_v25 = vld [vmem:[#allocation2 + $0x82] sm:$0xff] }
  0x7d   : > { %v772_v52 = vld [vmem:[#allocation2 + $0x89] sm:$0xff]  ;;  %v765_v56 = vadd.f32 %v763_v51, %v256_v30  ;;  %v773_v57 = vld [vmem:[#allocation2 + $0x91] sm:$0xff]  ;;  %v783_v58 = vadd.f32 %v763_v51, %v258_v32  ;;  %v766_v60 = vadd.f32 %v764_v55, %v1572_v13  ;;  %v782_v29 = vadd.f32 %v780_v25, %v1572_v13 }
  0x7e   : > { %352 = vrot.lane.b32.xlu1 %v1534_v16, %s1271_s28  ;;  %350 = vrot.lane.b32.xlu0 %v1528_v61, %s1271_s28  ;;  %v775_v62 = vadd.f32 %v773_v57, %v772_v52  ;;  %v774_v20 = vadd.f32 %v772_v52, %v771_v17  ;;  %v543_v13 = vld [vmem:[#allocation2 + $0x4b] sm:$0xff]  ;;  %v558_v50 = vmul.f32 0.21300554, %v556_v5 }
  0x7f   : > { %v767_v11 = vmul.f32 0.0010283801, %v765_v56  ;;  %v768_v14 = vmul.f32 0.0010283801, %v766_v60  ;;  %v785_v24 = vmul.f32 0.036000773, %v783_v58  ;;  %v547_v8 = vadd.f32 %v545_v0, %v543_v13 }
  0x80   : > { %v777_v18 = vmul.f32 0.007598758, %v775_v62  ;;  %v776_v28 = vmul.f32 0.007598758, %v774_v20  ;;  %v784_v32 = vmul.f32 0.036000773, %v782_v29 }
  0x81   : > { %v770_v26 = vadd.f32 %v768_v14, %v760_v59  ;;  %v769_v27 = vadd.f32 %v767_v11, %v759_v19  ;;  %v549_v40 = vmul.f32 0.10936069, %v547_v8  ;;  %v667_v45 = vld [vmem:[#allocation2 + $0x67] sm:$0xff]  ;;  %v672_v56 = vmul.f32 0.10936069, %v670_v7  ;;  %v791_v43 = vld [vmem:[#allocation2 + $0x8f] sm:$0xff] }
  0x82   : > { %362 = vrot.lane.b32.xlu1 %v1534_v16, %s1272_s24  ;;  %360 = vrot.lane.b32.xlu0 %v1528_v61, %s1272_s24  ;;  %v676_v51 = vld [vmem:[#allocation2 + $0x6c] sm:$0xff]  ;;  %v669_v53 = vadd.f32 %v667_v45, %v665_v44  ;;  %v675_v54 = vld [vmem:[#allocation2 + $0x64] sm:$0xff]  ;;  %v1657_v59 = vadd.f32 %v558_v50, %v550_v49 }
  0x83   : > { %v779_v30 = vadd.f32 %v777_v18, %v770_v26  ;;  %v778_v31 = vadd.f32 %v776_v28, %v769_v27  ;;  %v551_v48 = vadd.f32 %v549_v40, %v1549_v47  ;;  %v678_v52 = vld [vmem:[#allocation2 + $0x6e] sm:$0xff]  ;;  %v677_v55 = vld [vmem:[#allocation2 + $0x66] sm:$0xff]  ;;  %v674_v60 = vadd.f32 %v672_v56, %v1568_v6 }
  0x84   : > { %v680_v57 = vadd.f32 %v678_v52, %v676_v51  ;;  %v671_v47 = vmul.f32 0.10936069, %v669_v53  ;;  %v679_v12 = vadd.f32 %v677_v55, %v675_v54  ;;  %v789_v42 = vld [vmem:[#allocation2 + $0x8b] sm:$0xff]  ;;  %v788_v44 = vld [vmem:[#allocation2 + $0x83] sm:$0xff] }
  0x85   : > { %v1609_v35 = vadd.f32 %v785_v24, %v779_v30  ;;  %v1611_v36 = vadd.f32 %v784_v32, %v778_v31  ;;  %v1655_v58 = vadd.f32 %v559_v46, %v551_v48  ;;  %v790_v45 = vld [vmem:[#allocation2 + $0x87] sm:$0xff]  ;;  %v793_v50 = vadd.f32 %v791_v43, %v789_v42 }
  0x86   : > { %366 = vrot.lane.b32.xlu1 %v1534_v16, %s1273_s26  ;;  %364 = vrot.lane.b32.xlu0 %v1528_v61, %s1273_s26  ;;  %v682_v62 = vmul.f32 0.21300554, %v680_v57  ;;  %v673_v63 = vadd.f32 %v671_v47, %v1584_v37  ;;  %v681_v11 = vmul.f32 0.21300554, %v679_v12  ;;  %v799_v51 = vld [vmem:[#allocation2 + $0x8c] sm:$0xff]  ;;  %v792_v53 = vadd.f32 %v790_v45, %v788_v44  ;;  %v798_v56 = vld [vmem:[#allocation2 + $0x84] sm:$0xff] }
  0x87   : > { %v801_v52 = vld [vmem:[#allocation2 + $0x8e] sm:$0xff]  ;;  %v800_v57 = vld [vmem:[#allocation2 + $0x86] sm:$0xff] }
  0x88   : > { %v1669_v15 = vadd.f32 %v682_v62, %v674_v60  ;;  %v1671_v17 = vadd.f32 %v681_v11, %v673_v63  ;;  %v795_v63 = vmul.f32 0.10936069, %v793_v50  ;;  %v803_v11 = vadd.f32 %v801_v52, %v799_v51 }
  0x8a   : > { %376 = vrot.lane.b32.xlu1 %v1534_v16, %s1274_s27  ;;  %374 = vrot.lane.b32.xlu0 %v1528_v61, %s1274_s27 }
  0x8e   : > { %380 = vrot.lane.b32.xlu1 %v1534_v16, %s1275_s25  ;;  %378 = vrot.lane.b32.xlu0 %v1528_v61, %s1275_s25 }
  0x92   : > { %441 = vrot.lane.b32.xlu1 %v1605_v33, %s1267_s5  ;;  %439 = vrot.lane.b32.xlu0 %v1607_v34, %s1267_s5 }
  0x96   : > { %447 = vrot.lane.b32.xlu1 %v1605_v33, %s1266_s20  ;;  %445 = vrot.lane.b32.xlu0 %v1607_v34, %s1266_s20 }
  0x9a   : > { %457 = vrot.lane.b32.xlu1 %v1605_v33, %s1268_s6  ;;  %455 = vrot.lane.b32.xlu0 %v1607_v34, %s1268_s6 }
  0x9e   : > { %461 = vrot.lane.b32.xlu1 %v1605_v33, %s1269_s14  ;;  %459 = vrot.lane.b32.xlu0 %v1607_v34, %s1269_s14 }
  0xa2   : > { %471 = vrot.lane.b32.xlu1 %v1605_v33, %s1270_s17  ;;  %469 = vrot.lane.b32.xlu0 %v1607_v34, %s1270_s17 }
  0xa6   : > { %475 = vrot.lane.b32.xlu1 %v1605_v33, %s1271_s28  ;;  %473 = vrot.lane.b32.xlu0 %v1607_v34, %s1271_s28 }
  0xaa   : > { %485 = vrot.lane.b32.xlu1 %v1605_v33, %s1272_s24  ;;  %483 = vrot.lane.b32.xlu0 %v1607_v34, %s1272_s24 }
  0xae   : > { %489 = vrot.lane.b32.xlu1 %v1605_v33, %s1273_s26  ;;  %487 = vrot.lane.b32.xlu0 %v1607_v34, %s1273_s26 }
  0xb2   : > { %499 = vrot.lane.b32.xlu1 %v1605_v33, %s1274_s27  ;;  %497 = vrot.lane.b32.xlu0 %v1607_v34, %s1274_s27 }
  0xb6   : > { %503 = vrot.lane.b32.xlu1 %v1605_v33, %s1275_s25  ;;  %501 = vrot.lane.b32.xlu0 %v1607_v34, %s1275_s25 }
  0xba   : > { %564 = vrot.lane.b32.xlu1 %v1655_v58, %s1267_s5  ;;  %562 = vrot.lane.b32.xlu0 %v1657_v59, %s1267_s5 }
  0xbe   : > { %570 = vrot.lane.b32.xlu1 %v1655_v58, %s1266_s20  ;;  %568 = vrot.lane.b32.xlu0 %v1657_v59, %s1266_s20 }
  0xc2   : > { %693 = vrot.lane.b32.xlu1 %v1669_v15, %s1266_s20  ;;  %691 = vrot.lane.b32.xlu0 %v1671_v17, %s1266_s20 }
  0xc6   : > { %580 = vrot.lane.b32.xlu1 %v1655_v58, %s1268_s6  ;;  %578 = vrot.lane.b32.xlu0 %v1657_v59, %s1268_s6 }
  0xca   : > { %584 = vrot.lane.b32.xlu1 %v1655_v58, %s1269_s14  ;;  %582 = vrot.lane.b32.xlu0 %v1657_v59, %s1269_s14 }
  0xce   : > { %687 = vrot.lane.b32.xlu1 %v1669_v15, %s1267_s5  ;;  %685 = vrot.lane.b32.xlu0 %v1671_v17, %s1267_s5 }
  0xd2   : > { %703 = vrot.lane.b32.xlu1 %v1669_v15, %s1268_s6  ;;  %701 = vrot.lane.b32.xlu0 %v1671_v17, %s1268_s6 }
  0xd6   : > { %707 = vrot.lane.b32.xlu1 %v1669_v15, %s1269_s14  ;;  %705 = vrot.lane.b32.xlu0 %v1671_v17, %s1269_s14 }
  0xda   : > { %594 = vrot.lane.b32.xlu1 %v1655_v58, %s1270_s17  ;;  %592 = vrot.lane.b32.xlu0 %v1657_v59, %s1270_s17 }
  0xdc   : > { %v323_v6 = vpop.permute.xlu1 %322  ;;  %v317_v37 = vpop.permute.xlu0 %316 }
  0xde   : > { %598 = vrot.lane.b32.xlu1 %v1655_v58, %s1271_s28  ;;  %596 = vrot.lane.b32.xlu0 %v1657_v59, %s1271_s28 }
  0xe0   : > { %v325_v14 = vpop.permute.xlu1 %324  ;;  %v319_v18 = vpop.permute.xlu0 %318 }
  0xe1   : > { %v327_v19 = vadd.f32 %v325_v14, %v1534_v16  ;;  %v321_v21 = vmul.f32 0.26601171, %v319_v18  ;;  %v326_v16 = vadd.f32 %v323_v6, %v1528_v61  ;;  %v320_v61 = vmul.f32 0.26601171, %v317_v37 }
  0xe2   : > { %717 = vrot.lane.b32.xlu1 %v1669_v15, %s1270_s17  ;;  %715 = vrot.lane.b32.xlu0 %v1671_v17, %s1270_s17  ;;  %v794_v6 = vmul.f32 0.10936069, %v792_v53  ;;  %v802_v37 = vadd.f32 %v800_v57, %v798_v56 }
  0xe3   : > { %v329_v20 = vmul.f32 0.0010283801, %v327_v19  ;;  %v328_v32 = vmul.f32 0.0010283801, %v326_v16 }
  0xe4   : > { %v335_v22 = vpop.permute.xlu1 %334  ;;  %v333_v23 = vpop.permute.xlu0 %332 }
  0xe5   : > { %v331_v24 = vadd.f32 %v329_v20, %v321_v21  ;;  %v330_v8 = vadd.f32 %v328_v32, %v320_v61  ;;  %v797_v21 = vadd.f32 %v795_v63, %v1609_v35 }
  0xe6   : > { %721 = vrot.lane.b32.xlu1 %v1669_v15, %s1271_s28  ;;  %719 = vrot.lane.b32.xlu0 %v1671_v17, %s1271_s28 }
  0xe8   : > { %v339_v25 = vpop.permute.xlu1 %338  ;;  %v337_v26 = vpop.permute.xlu0 %336 }
  0xe9   : > { %v341_v27 = vadd.f32 %v339_v25, %v335_v22  ;;  %v340_v28 = vadd.f32 %v337_v26, %v333_v23  ;;  %v805_v22 = vmul.f32 0.21300554, %v803_v11  ;;  %v796_v23 = vadd.f32 %v794_v6, %v1611_v36 }
  0xea   : > { %608 = vrot.lane.b32.xlu1 %v1655_v58, %s1272_s24  ;;  %606 = vrot.lane.b32.xlu0 %v1657_v59, %s1272_s24 }
  0xeb   : > { %v343_v29 = vmul.f32 0.007598758, %v341_v27  ;;  %v342_v0 = vmul.f32 0.007598758, %v340_v28 }
  0xec   : > { %v349_v30 = vpop.permute.xlu1 %348  ;;  %v347_v31 = vpop.permute.xlu0 %346 }
  0xed   : > { %v345_v13 = vadd.f32 %v343_v29, %v331_v24  ;;  %v344_v9 = vadd.f32 %v342_v0, %v330_v8  ;;  %v804_v24 = vmul.f32 0.21300554, %v802_v37 }
  0xee   : > { %612 = vrot.lane.b32.xlu1 %v1655_v58, %s1273_s26  ;;  %610 = vrot.lane.b32.xlu0 %v1657_v59, %s1273_s26 }
  0xef   : > { %v1755_v35 = vadd.f32 %v804_v24, %v796_v23 }
  0xf0   : > { %v353_v1 = vpop.permute.xlu1 %352  ;;  %v351_v4 = vpop.permute.xlu0 %350 }
  0xf1   : > { %v355_v2 = vadd.f32 %v353_v1, %v349_v30  ;;  %v354_v3 = vadd.f32 %v351_v4, %v347_v31  ;;  %v1753_v30 = vadd.f32 %v805_v22, %v797_v21 }
  0xf2   : > { %731 = vrot.lane.b32.xlu1 %v1669_v15, %s1272_s24  ;;  %729 = vrot.lane.b32.xlu0 %v1671_v17, %s1272_s24 }
  0xf3   : > { %v357_v10 = vmul.f32 0.036000773, %v355_v2  ;;  %v356_v38 = vmul.f32 0.036000773, %v354_v3 }
  0xf4   : > { %v363_v39 = vpop.permute.xlu1 %362  ;;  %v361_v40 = vpop.permute.xlu0 %360 }
  0xf5   : > { %v359_v41 = vadd.f32 %v357_v10, %v345_v13  ;;  %v358_v5 = vadd.f32 %v356_v38, %v344_v9 }
  0xf6   : > { %735 = vrot.lane.b32.xlu1 %v1669_v15, %s1273_s26  ;;  %733 = vrot.lane.b32.xlu0 %v1671_v17, %s1273_s26 }
  0xf8   : > { %v367_v46 = vpop.permute.xlu1 %366  ;;  %v365_v7 = vpop.permute.xlu0 %364 }
  0xf9   : > { %v369_v48 = vadd.f32 %v367_v46, %v363_v39  ;;  %v368_v49 = vadd.f32 %v365_v7, %v361_v40 }
  0xfa   : > { %622 = vrot.lane.b32.xlu1 %v1655_v58, %s1274_s27  ;;  %620 = vrot.lane.b32.xlu0 %v1657_v59, %s1274_s27 }
  0xfb   : > { %v371_v54 = vmul.f32 0.10936069, %v369_v48  ;;  %v370_v55 = vmul.f32 0.10936069, %v368_v49 }
  0xfc   : > { %v377_v47 = vpop.permute.xlu1 %376  ;;  %v375_v12 = vpop.permute.xlu0 %374 }
  0xfd   : > { %v373_v60 = vadd.f32 %v371_v54, %v359_v41  ;;  %v372_v62 = vadd.f32 %v370_v55, %v358_v5 }
  0xfe   : > { %626 = vrot.lane.b32.xlu1 %v1655_v58, %s1275_s25  ;;  %624 = vrot.lane.b32.xlu0 %v1657_v59, %s1275_s25 }
 0x100   : > { %v381_v14 = vpop.permute.xlu1 %380  ;;  %v379_v18 = vpop.permute.xlu0 %378 }
 0x101   : > { %v383_v19 = vadd.f32 %v381_v14, %v377_v47  ;;  %v382_v20 = vadd.f32 %v379_v18, %v375_v12 }
 0x102   : > { %745 = vrot.lane.b32.xlu1 %v1669_v15, %s1274_s27  ;;  %743 = vrot.lane.b32.xlu0 %v1671_v17, %s1274_s27 }
 0x103   : > { %v385_v25 = vmul.f32 0.21300554, %v383_v19  ;;  %v384_v26 = vmul.f32 0.21300554, %v382_v20 }
 0x104   : > { %v442_v16 = vpop.permute.xlu1 %441  ;;  %v440_v27 = vpop.permute.xlu0 %439 }
 0x105   : > { %v1745_v28 = vadd.f32 %v385_v25, %v373_v60  ;;  %v1747_v29 = vadd.f32 %v384_v26, %v372_v62  ;;  %v444_v61 = vmul.f32 0.26601171, %v442_v16  ;;  %v443_v0 = vmul.f32 0.26601171, %v440_v27 }
 0x106   : > { %749 = vrot.lane.b32.xlu1 %v1669_v15, %s1275_s25  ;;  %747 = vrot.lane.b32.xlu0 %v1671_v17, %s1275_s25 }
 0x107   : > { %v1797_v25 = vmul.f32 %v1745_v28, %v1745_v28  ;;  %v1801_v26 = vmul.f32 %v1747_v29, %v1747_v29 }
 0x108   : > { %v448_v36 = vpop.permute.xlu1 %447  ;;  %v446_v31 = vpop.permute.xlu0 %445 }
 0x109   : > { %v450_v32 = vadd.f32 %v448_v36, %v1605_v33  ;;  %v449_v13 = vadd.f32 %v446_v31, %v1607_v34 }
 0x10a   : > { %816 = vrot.lane.b32.xlu1 %v1753_v30, %s1266_s20  ;;  %814 = vrot.lane.b32.xlu0 %v1755_v35, %s1266_s20  ;;  %s1190_s20 = scalar_lea.vmem %s1871_s4, 128 }
 0x10b   : > { %v452_v1 = vmul.f32 0.0010283801, %v450_v32  ;;  %v451_v4 = vmul.f32 0.0010283801, %v449_v13  ;;  %p1191_p13 = scmp.ne.s32.totalorder %s1871_s4, %s1190_s20 }
 0x10c   : > { %v458_v8 = vpop.permute.xlu1 %457  ;;  %v456_v2 = vpop.permute.xlu0 %455 }
 0x10d   : > { %v454_v3 = vadd.f32 %v452_v1, %v444_v61  ;;  %v453_v9 = vadd.f32 %v451_v4, %v443_v0  ;;  %p1192_p12 = pnand %p1191_p13, %p1929_p1 }
 0x10e   : > { %810 = vrot.lane.b32.xlu1 %v1753_v30, %s1267_s5  ;;  %808 = vrot.lane.b32.xlu0 %v1755_v35, %s1267_s5  ;;  %s1194_s5 = sshll.u32 %s1277_s13, 4  ;;  %s1195_s5 = int_to_ptr.vmem [resolvable:$false] %s1194_s5 }
 0x10f   : > { %p1193_p10 = pneg %p1192_p12  ;;  %p1197_p5 = scmp.lt.s32.totalorder %s1871_s4, %s1195_s5 }
 0x110   : > { %v462_v33 = vpop.permute.xlu1 %461  ;;  %v460_v34 = vpop.permute.xlu0 %459 }
 0x111   : > { %v464_v10 = vadd.f32 %v462_v33, %v458_v8  ;;  %v463_v38 = vadd.f32 %v460_v34, %v456_v2 }
 0x112   : > { %826 = vrot.lane.b32.xlu1 %v1753_v30, %s1268_s6  ;;  %824 = vrot.lane.b32.xlu0 %v1755_v35, %s1268_s6  ;;  %s1196_s6 = scalar_lea.vmem %s1195_s5, 256 }
 0x113   : > { %v466_v39 = vmul.f32 0.007598758, %v464_v10  ;;  %v465_v40 = vmul.f32 0.007598758, %v463_v38  ;;  %p1198_p7 = scmp.lt.s32.totalorder %s1196_s6, %s1190_s20 }
 0x114   : > { %v472_v41 = vpop.permute.xlu1 %471  ;;  %v470_v5 = vpop.permute.xlu0 %469 }
 0x115   : > { %v468_v42 = vadd.f32 %v466_v39, %v454_v3  ;;  %v467_v43 = vadd.f32 %v465_v40, %v453_v9  ;;  %p1199_p9 = por %p1198_p7, %p1197_p5 }
 0x116   : > { %830 = vrot.lane.b32.xlu1 %v1753_v30, %s1269_s14  ;;  %828 = vrot.lane.b32.xlu0 %v1755_v35, %s1269_s14 }
 0x117   : > { %p1200_p11 = pnand %p1199_p9, %p1193_p10 }
 0x118   : > { %v476_v44 = vpop.permute.xlu1 %475  ;;  %v474_v45 = vpop.permute.xlu0 %473 }
 0x119   : > { %v478_v46 = vadd.f32 %v476_v44, %v472_v41  ;;  %v477_v7 = vadd.f32 %v474_v45, %v470_v5 }
 0x11a   : > { %840 = vrot.lane.b32.xlu1 %v1753_v30, %s1270_s17  ;;  %838 = vrot.lane.b32.xlu0 %v1755_v35, %s1270_s17 }
 0x11b   : > { %v480_v48 = vmul.f32 0.036000773, %v478_v46  ;;  %v479_v49 = vmul.f32 0.036000773, %v477_v7 }
 0x11c   : > { %v486_v50 = vpop.permute.xlu1 %485  ;;  %v484_v51 = vpop.permute.xlu0 %483 }
 0x11d   : > { %v482_v52 = vadd.f32 %v480_v48, %v468_v42  ;;  %v481_v53 = vadd.f32 %v479_v49, %v467_v43 }
 0x11e   : > { %844 = vrot.lane.b32.xlu1 %v1753_v30, %s1271_s28  ;;  %842 = vrot.lane.b32.xlu0 %v1755_v35, %s1271_s28 }
 0x120   : > { %v490_v54 = vpop.permute.xlu1 %489  ;;  %v488_v55 = vpop.permute.xlu0 %487 }
 0x121   : > { %v492_v56 = vadd.f32 %v490_v54, %v486_v50  ;;  %v491_v57 = vadd.f32 %v488_v55, %v484_v51 }
 0x122   : > { %854 = vrot.lane.b32.xlu1 %v1753_v30, %s1272_s24  ;;  %852 = vrot.lane.b32.xlu0 %v1755_v35, %s1272_s24 }
 0x123   : > { %v494_v47 = vmul.f32 0.10936069, %v492_v56  ;;  %v493_v12 = vmul.f32 0.10936069, %v491_v57 }
 0x124   : > { %v500_v60 = vpop.permute.xlu1 %499  ;;  %v498_v62 = vpop.permute.xlu0 %497 }
 0x125   : > { %v496_v63 = vadd.f32 %v494_v47, %v482_v52  ;;  %v495_v11 = vadd.f32 %v493_v12, %v481_v53 }
 0x126   : > { %858 = vrot.lane.b32.xlu1 %v1753_v30, %s1273_s26  ;;  %856 = vrot.lane.b32.xlu0 %v1755_v35, %s1273_s26 }
 0x128   : > { %v504_v6 = vpop.permute.xlu1 %503  ;;  %v502_v37 = vpop.permute.xlu0 %501 }
 0x129   : > { %v506_v14 = vadd.f32 %v504_v6, %v500_v60  ;;  %v505_v18 = vadd.f32 %v502_v37, %v498_v62 }
 0x12a   : > { %868 = vrot.lane.b32.xlu1 %v1753_v30, %s1274_s27  ;;  %866 = vrot.lane.b32.xlu0 %v1755_v35, %s1274_s27 }
 0x12b   : > { %v508_v19 = vmul.f32 0.21300554, %v506_v14  ;;  %v507_v20 = vmul.f32 0.21300554, %v505_v18 }
 0x12c   : > { %v565_v21 = vpop.permute.xlu1 %564  ;;  %v563_v22 = vpop.permute.xlu0 %562 }
 0x12d   : > { %v510_v23 = vadd.f32 %v508_v19, %v496_v63  ;;  %v509_v24 = vadd.f32 %v507_v20, %v495_v11  ;;  %v567_v4 = vmul.f32 0.26601171, %v565_v21  ;;  %v566_v8 = vmul.f32 0.26601171, %v563_v22 }
 0x12e   : > { %872 = vrot.lane.b32.xlu1 %v1753_v30, %s1275_s25  ;;  %870 = vrot.lane.b32.xlu0 %v1755_v35, %s1275_s25 }
 0x12f   : > { %v1807_v16 = vmul.f32 %v510_v23, %v510_v23  ;;  %v1810_v27 = vmul.f32 %v510_v23, %v1745_v28  ;;  %v1812_v36 = vmul.f32 %v509_v24, %v509_v24  ;;  %v1815_v31 = vmul.f32 %v509_v24, %v1747_v29 }
 0x130   : > { %v571_v32 = vpop.permute.xlu1 %570  ;;  %v569_v13 = vpop.permute.xlu0 %568 }
 0x131   : > { %v1819_v61 = vadd.f32 %v1807_v16, %v1797_v25  ;;  %v1823_v0 = vadd.f32 %v1812_v36, %v1801_v26  ;;  %v573_v1 = vadd.f32 %v571_v32, %v1655_v58  ;;  %v572_v28 = vadd.f32 %v569_v13, %v1657_v59 }
 0x133   : > { %v575_v2 = vmul.f32 0.0010283801, %v573_v1  ;;  %v574_v3 = vmul.f32 0.0010283801, %v572_v28 }
 0x134   : > { %v694_v29 = vpop.permute.xlu1 %693  ;;  %v692_v9 = vpop.permute.xlu0 %691 }
 0x135   : > { %v577_v33 = vadd.f32 %v575_v2, %v567_v4  ;;  %v576_v34 = vadd.f32 %v574_v3, %v566_v8  ;;  %v696_v39 = vadd.f32 %v694_v29, %v1669_v15  ;;  %v695_v40 = vadd.f32 %v692_v9, %v1671_v17 }
 0x137   : > { %v698_v44 = vmul.f32 0.0010283801, %v696_v39  ;;  %v697_v45 = vmul.f32 0.0010283801, %v695_v40 }
 0x138   : > { %v581_v10 = vpop.permute.xlu1 %580  ;;  %v579_v38 = vpop.permute.xlu0 %578 }
 0x13c   : > { %v585_v41 = vpop.permute.xlu1 %584  ;;  %v583_v5 = vpop.permute.xlu0 %582 }
 0x13d   : > { %v587_v42 = vadd.f32 %v585_v41, %v581_v10  ;;  %v586_v58 = vadd.f32 %v583_v5, %v579_v38 }
 0x13f   : > { %v589_v43 = vmul.f32 0.007598758, %v587_v42  ;;  %v588_v59 = vmul.f32 0.007598758, %v586_v58 }
 0x140   : > { %v688_v46 = vpop.permute.xlu1 %687  ;;  %v686_v7 = vpop.permute.xlu0 %685 }
 0x141   : > { %v591_v48 = vadd.f32 %v589_v43, %v577_v33  ;;  %v590_v49 = vadd.f32 %v588_v59, %v576_v34  ;;  %v690_v50 = vmul.f32 0.26601171, %v688_v46  ;;  %v689_v51 = vmul.f32 0.26601171, %v686_v7 }
 0x143   : > { %v700_v52 = vadd.f32 %v698_v44, %v690_v50  ;;  %v699_v53 = vadd.f32 %v697_v45, %v689_v51 }
 0x144   : > { %v704_v54 = vpop.permute.xlu1 %703  ;;  %v702_v15 = vpop.permute.xlu0 %701 }
 0x148   : > { %v708_v55 = vpop.permute.xlu1 %707  ;;  %v706_v17 = vpop.permute.xlu0 %705 }
 0x149   : > { %v710_v56 = vadd.f32 %v708_v55, %v704_v54  ;;  %v709_v57 = vadd.f32 %v706_v17, %v702_v15 }
 0x14b   : > { %v712_v47 = vmul.f32 0.007598758, %v710_v56  ;;  %v711_v12 = vmul.f32 0.007598758, %v709_v57 }
 0x14c   : > { %v595_v60 = vpop.permute.xlu1 %594  ;;  %v593_v62 = vpop.permute.xlu0 %592 }
 0x14d   : > { %v714_v63 = vadd.f32 %v712_v47, %v700_v52  ;;  %v713_v11 = vadd.f32 %v711_v12, %v699_v53 }
 0x150   : > { %v599_v6 = vpop.permute.xlu1 %598  ;;  %v597_v37 = vpop.permute.xlu0 %596 }
 0x151   : > { %v601_v1 = vadd.f32 %v599_v6, %v595_v60  ;;  %v600_v28 = vadd.f32 %v597_v37, %v593_v62 }
 0x153   : > { %v603_v29 = vmul.f32 0.036000773, %v601_v1  ;;  %v602_v9 = vmul.f32 0.036000773, %v600_v28 }
 0x154   : > { %v718_v14 = vpop.permute.xlu1 %717  ;;  %v716_v18 = vpop.permute.xlu0 %715 }
 0x155   : > { %v605_v39 = vadd.f32 %v603_v29, %v591_v48  ;;  %v604_v40 = vadd.f32 %v602_v9, %v590_v49 }
 0x158   : > { %v722_v19 = vpop.permute.xlu1 %721  ;;  %v720_v20 = vpop.permute.xlu0 %719 }
 0x159   : > { %v724_v42 = vadd.f32 %v722_v19, %v718_v14  ;;  %v723_v58 = vadd.f32 %v720_v20, %v716_v18 }
 0x15b   : > { %v726_v54 = vmul.f32 0.036000773, %v724_v42  ;;  %v725_v15 = vmul.f32 0.036000773, %v723_v58 }
 0x15c   : > { %v609_v21 = vpop.permute.xlu1 %608  ;;  %v607_v22 = vpop.permute.xlu0 %606 }
 0x15d   : > { %v728_v60 = vadd.f32 %v726_v54, %v714_v63  ;;  %v727_v62 = vadd.f32 %v725_v15, %v713_v11  ;;  %v905_v63 = vadd.f32 0.0001, %v1819_v61  ;;  %v904_v11 = vadd.f32 0.0001, %v1823_v0 }
 0x160   : > { %v613_v23 = vpop.permute.xlu1 %612  ;;  %v611_v24 = vpop.permute.xlu0 %610 }
 0x161   : > { %v615_v2 = vadd.f32 %v613_v23, %v609_v21  ;;  %v614_v3 = vadd.f32 %v611_v24, %v607_v22 }
 0x163   : > { %v617_v10 = vmul.f32 0.10936069, %v615_v2  ;;  %v616_v38 = vmul.f32 0.10936069, %v614_v3 }
 0x164   : > { %v732_v32 = vpop.permute.xlu1 %731  ;;  %v730_v13 = vpop.permute.xlu0 %729 }
 0x165   : > { %v619_v44 = vadd.f32 %v617_v10, %v605_v39  ;;  %v618_v45 = vadd.f32 %v616_v38, %v604_v40  ;;  %v202_v39 = vlaneseq }
 0x167   : > { %v205_v61 = vand.u32 127, %v202_v39 }
 0x168   : > { %v736_v4 = vpop.permute.xlu1 %735  ;;  %v734_v8 = vpop.permute.xlu0 %733 }
 0x169   : > { %v738_v46 = vadd.f32 %v736_v4, %v732_v32  ;;  %v737_v7 = vadd.f32 %v734_v8, %v730_v13  ;;  %vm209_vm0 = vcmp.ge.s32.totalorder %v205_v61, 26  ;;  %vm210_vm1 = vcmp.lt.s32.totalorder %v205_v61, 42 }
 0x16a   : > { %vm207_vm2 = vcmp.lt.s32.totalorder %v205_v61, 16  ;;  %vm211_vm3 = vmand %vm209_vm0, %vm210_vm1  ;;  %vm213_vm4 = vcmp.ge.s32.totalorder %v205_v61, 52  ;;  %vm214_vm5 = vcmp.lt.s32.totalorder %v205_v61, 68  ;;  %vm217_vm8 = vcmp.ge.s32.totalorder %v205_v61, 78 }
 0x16b   : > { %v740_v48 = vmul.f32 0.10936069, %v738_v46  ;;  %v739_v49 = vmul.f32 0.10936069, %v737_v7  ;;  %vm1845_vm6 = vmor %vm207_vm2, %vm211_vm3  ;;  %vm218_vm9 = vcmp.lt.s32.totalorder %v205_v61, 94 }
 0x16c   : > { %v623_v33 = vpop.permute.xlu1 %622  ;;  %v621_v34 = vpop.permute.xlu0 %620  ;;  %vm1849_vm7 = vmand %vm213_vm4, %vm214_vm5 }
 0x16d   : > { %v742_v14 = vadd.f32 %v740_v48, %v728_v60  ;;  %v741_v18 = vadd.f32 %v739_v49, %v727_v62  ;;  %vm216_vm10 = vmor %vm1845_vm6, %vm1849_vm7 }
 0x16e   : > { %vm219_vm11 = vmand %vm217_vm8, %vm218_vm9 }
 0x16f   : > { %vm220_vm12 = vmor %vm216_vm10, %vm219_vm11 }
 0x170   : > { %v627_v41 = vpop.permute.xlu1 %626  ;;  %v625_v5 = vpop.permute.xlu0 %624 }
 0x171   : > { %v629_v43 = vadd.f32 %v627_v41, %v623_v33  ;;  %v628_v59 = vadd.f32 %v625_v5, %v621_v34 }
 0x173   : > { %v631_v50 = vmul.f32 0.21300554, %v629_v43  ;;  %v630_v51 = vmul.f32 0.21300554, %v628_v59 }
 0x174   : > { %v746_v52 = vpop.permute.xlu1 %745  ;;  %v744_v53 = vpop.permute.xlu0 %743 }
 0x175   : > { %v633_v55 = vadd.f32 %v631_v50, %v619_v44  ;;  %v632_v17 = vadd.f32 %v630_v51, %v618_v45 }
 0x177   : > { %v887_v56 = vsub.f32 %v633_v55, %v1797_v25  ;;  %v886_v57 = vsub.f32 %v632_v17, %v1801_v26 }
 0x178   : > { %v750_v47 = vpop.permute.xlu1 %749  ;;  %v748_v12 = vpop.permute.xlu0 %747 }
 0x179   : > { %v752_v6 = vadd.f32 %v750_v47, %v746_v52  ;;  %v751_v37 = vadd.f32 %v748_v12, %v744_v53 }
 0x17b   : > { %v754_v19 = vmul.f32 0.21300554, %v752_v6  ;;  %v753_v20 = vmul.f32 0.21300554, %v751_v37 }
 0x17c   : > { %v817_v21 = vpop.permute.xlu1 %816  ;;  %v815_v22 = vpop.permute.xlu0 %814 }
 0x17d   : > { %v756_v23 = vadd.f32 %v754_v19, %v742_v14  ;;  %v755_v24 = vadd.f32 %v753_v20, %v741_v18  ;;  %v819_v0 = vadd.f32 %v817_v21, %v1753_v30  ;;  %v818_v5 = vadd.f32 %v815_v22, %v1755_v35 }
 0x17f   : > { %v889_v32 = vsub.f32 %v756_v23, %v1807_v16  ;;  %v888_v25 = vsub.f32 %v755_v24, %v1812_v36  ;;  %v821_v50 = vmul.f32 0.0010283801, %v819_v0  ;;  %v820_v51 = vmul.f32 0.0010283801, %v818_v5 }
 0x180   : > { %v811_v13 = vpop.permute.xlu1 %810  ;;  %v809_v26 = vpop.permute.xlu0 %808 }
 0x181   : > { %v907_v1 = vadd.f32 %v889_v32, %v887_v56  ;;  %v906_v28 = vadd.f32 %v888_v25, %v886_v57  ;;  %v813_v44 = vmul.f32 0.26601171, %v811_v13  ;;  %v812_v45 = vmul.f32 0.26601171, %v809_v26 }
 0x183   : > { %v909_v4 = vadd.f32 0.0009, %v907_v1  ;;  %v908_v8 = vadd.f32 0.0009, %v906_v28  ;;  %v823_v55 = vadd.f32 %v821_v50, %v813_v44  ;;  %v822_v17 = vadd.f32 %v820_v51, %v812_v45 }
 0x184   : > { %v827_v2 = vpop.permute.xlu1 %826  ;;  %v825_v3 = vpop.permute.xlu0 %824  ;;  %v203_v45 = vshrl.u32 %v202_v39, 7 }
 0x185   : > { %v1835_v29 = vmul.f32 %v909_v4, %v905_v63  ;;  %v1837_v9 = vmul.f32 %v908_v8, %v904_v11  ;;  %v893_v63 = vmul.f32 2.0, %v1810_v27  ;;  %v892_v11 = vmul.f32 2.0, %v1815_v31 }
 0x186   : > { %vm933_vm14 = vcmp.eq.s32.totalorder %v203_v45, 0 }
 0x187   : > { %1126 = vrcp.f32 %v1835_v29 }
 0x188   : > { %v831_v33 = vpop.permute.xlu1 %830  ;;  %v829_v16 = vpop.permute.xlu0 %828  ;;  %1128 = vrcp.f32 %v1837_v9 }
 0x189   : > { %v833_v42 = vadd.f32 %v831_v33, %v827_v2  ;;  %v832_v58 = vadd.f32 %v829_v16, %v825_v3 }
 0x18b   : > { %v835_v52 = vmul.f32 0.007598758, %v833_v42  ;;  %v834_v30 = vmul.f32 0.007598758, %v832_v58 }
 0x18c   : > { %v841_v34 = vpop.permute.xlu1 %840  ;;  %v839_v36 = vpop.permute.xlu0 %838 }
 0x18d   : > { %v837_v56 = vadd.f32 %v835_v52, %v823_v55  ;;  %v836_v57 = vadd.f32 %v834_v30, %v822_v17 }
 0x190   : > { %v845_v10 = vpop.permute.xlu1 %844  ;;  %v843_v38 = vpop.permute.xlu0 %842 }
 0x191   : > { %v847_v46 = vadd.f32 %v845_v10, %v841_v34  ;;  %v846_v7 = vadd.f32 %v843_v38, %v839_v36  ;;  %v1127_v14 = vpop.eup %1126  ;;  %v895_v34 = vadd.f32 0.0001, %v893_v63  ;;  %v1276_v36 = vmov 0  }
 0x192   : > { %v1129_v22 = vpop.eup %1128  ;;  %v915_v13 = vmul.f32 %v1127_v14, %v1835_v29  ;;  %v922_v29 = vsel %vm220_vm12, 1, %v1276_v36 }
 0x193   : > { %v849_v48 = vmul.f32 0.036000773, %v847_v46  ;;  %v848_v49 = vmul.f32 0.036000773, %v846_v7  ;;  %v914_v26 = vmul.f32 %v1129_v22, %v1837_v9  ;;  %v894_v9 = vadd.f32 0.0001, %v892_v11 }
 0x194   : > { %v855_v40 = vpop.permute.xlu1 %854  ;;  %v853_v41 = vpop.permute.xlu0 %852  ;;  %v917_v2 = vsub.f32 2.0, %v915_v13  ;;  %vm923_vm13 = vcmp.eq.s32.totalorder %v922_v29, 1 }
 0x195   : > { %v851_v18 = vadd.f32 %v849_v48, %v837_v56  ;;  %v850_v19 = vadd.f32 %v848_v49, %v836_v57  ;;  %v916_v3 = vsub.f32 2.0, %v914_v26 }
 0x197   : > { %v918_v61 = vmul.f32 %v1129_v22, %v916_v3 }
 0x198   : > { %v859_v43 = vpop.permute.xlu1 %858  ;;  %v857_v59 = vpop.permute.xlu0 %856 }
 0x199   : > { %v861_v53 = vadd.f32 %v859_v43, %v855_v40  ;;  %v860_v35 = vadd.f32 %v857_v59, %v853_v41  ;;  %v919_v41 = vmul.f32 %v1127_v14, %v917_v2 }
 0x19b   : > { %v863_v47 = vmul.f32 0.10936069, %v861_v53  ;;  %v862_v12 = vmul.f32 0.10936069, %v860_v35 }
 0x19c   : > { %v869_v54 = vpop.permute.xlu1 %868  ;;  %v867_v15 = vpop.permute.xlu0 %866 }
 0x19d   : > { %v865_v23 = vadd.f32 %v863_v47, %v851_v18  ;;  %v864_v24 = vadd.f32 %v862_v12, %v850_v19 }
 0x1a0   : > { %v873_v62 = vpop.permute.xlu1 %872  ;;  %v871_v6 = vpop.permute.xlu0 %870 }
 0x1a1   : > { %v875_v20 = vadd.f32 %v873_v62, %v869_v54  ;;  %v874_v21 = vadd.f32 %v871_v6, %v867_v15 }
 0x1a3   : > { %v877_v32 = vmul.f32 0.21300554, %v875_v20  ;;  %v876_v25 = vmul.f32 0.21300554, %v874_v21 }
 0x1a5   : > { %v879_v1 = vadd.f32 %v877_v32, %v865_v23  ;;  %v878_v28 = vadd.f32 %v876_v25, %v864_v24 }
 0x1a7   : > { %v891_v4 = vsub.f32 %v879_v1, %v1810_v27  ;;  %v890_v8 = vsub.f32 %v878_v28, %v1815_v31 }
 0x1a9   : > { %v897_v33 = vmul.f32 2.0, %v891_v4  ;;  %v896_v16 = vmul.f32 2.0, %v890_v8 }
 0x1ab   : > { %v899_v10 = vadd.f32 0.0009, %v897_v33  ;;  %v898_v38 = vadd.f32 0.0009, %v896_v16 }
 0x1ad   : > { %v901_v40 = vmul.f32 %v899_v10, %v895_v34  ;;  %v900_v0 = vmul.f32 %v898_v38, %v894_v9 }
 0x1af   : > { %v921_v27 = vmul.f32 %v919_v41, %v901_v40  ;;  %v920_v31 = vmul.f32 %v918_v61, %v900_v0 }
 0x1b1   : > { %v924_v5 = vsel %vm923_vm13, %v920_v31, 0.0  ;;  %v925_v42 = vsel %vm923_vm13, %v921_v27, 0.0 }
 0x1b2   : > { %v926_v58 = vadd.f32 %v925_v42, %v924_v5 }
 0x1b4   : > { %v927_v43 = vrot.slane %v926_v58, 4 }
 0x1b6   : > { %v928_v59 = vadd.f32 %v927_v43, %v926_v58 }
 0x1b8   : > { %v929_v44 = vrot.slane %v928_v59, 2 }
 0x1ba   : > { %v930_v46 = vadd.f32 %v929_v44, %v928_v59 }
 0x1bc   : > { %v931_v7 = vrot.slane %v930_v46, 1 }
 0x1be   : > { %v932_v50 = vadd.f32 %v931_v7, %v930_v46 }
 0x1c0   : > { %v934_v51 = vsel %vm933_vm14, %v932_v50, 0.0 }
 0x1c1   : > { %935 = vst [vmem:[%s201_s16] sm:$0xff] %v934_v51 }
 0x1c2   : > { %1203 = shalt.err (!%p1200_p11)
}
 0x1c3   : > { %s1204_s30 = scalar_lea.hbm %s1869_s23, 128  ;;  %s1208_s28 = scalar_lea.hbm %s1915_s2, 256 }
 0x1c4   : > { %p1205_p3 = scmp.ne.s32.totalorder %s1869_s23, %s1204_s30  ;;  %p1209_p2 = scmp.lt.u32.totalorder %s1869_s23, %s1915_s2 }
 0x1c5   : > { %p1210_p4 = scmp.lt.u32.totalorder %s1208_s28, %s1204_s30  ;;  %p1212_p13 = scmp.lt.u32.totalorder %s1204_s30, %s1869_s23 }
 0x1c6   : > { %p1206_p8 = pnand %p1205_p3, %p1929_p1 }
 0x1c7   : > { %p1211_p6 = por %p1210_p4, %p1209_p2 }
 0x1c8   : > { %p1207_p0 = pneg %p1206_p8 }
 0x1c9   : > { %p1213_p12 = por %p1212_p13, %p1211_p6 }
 0x1cb   : > { %p1214_p10 = pnand %p1213_p12, %p1207_p0 }
 0x1cd   : > { %1217 = shalt.err (!%p1214_p10)
}
 0x1ce   : > { %1066 = dma.vmem_to_hbm [thread:$0]  (%p1929_p1), %s1871_s4, 128, %s1869_s23, %s937_s29  }
 0x1cf PF: > { %s962_s27 = sand.u32 1, %s1248_s9   ;;  %p1930_p5 = scmp.ne.s32.totalorder %s1921_s22, 0 }
 0x1d0   : > { %p1931_p7 = scmp.ge.s32.totalorder %s1260_s12, 2  ;;  %s963_s25 = scalar_lea.sflag [#allocation5], %s962_s27 }
 0x1d2   : > { %p1076_p9 = pnand %p1931_p7, %p1930_p5 }
 0x1d4   : > { %1243 = dma.done.wait (!%p1076_p9), %s963_s25, 128  }
 0x1d5   : > { %1245 = vsyncadd (!%p1076_p9), %s963_s25, 4294967168  ;;  %p18_p11 = scmp.ge.s32.totalorder %s1318_s15, 4   ;;  %s1932_s9 = smov %s1252_s10 }
 0x1d6   : > { %s1933_s10 = smov %s1256_s11  ;;  %s1934_s11 = smov %s1330_s18 }
 0x1d7   : > { %s1935_s12 = smov %s1318_s15  ;;  %20 = sbr.rel (!%p18_p11) target bundleno = 7 (0x7), region = 90 }
 0x1de   :  { %968 = vsyncpa [#allocation4], 1 }
 0x1df   :  { %970 = vsyncpa [#allocation4 + $0x1], 1 }
 0x1e0   :  { %971 = vsyncpa [#allocation7], 1 }
 0x1e1   :  { %973 = vsyncpa [#allocation7 + $0x1], 1 }
 0x1e2   :  { %974 = vsyncpa [#allocation5], 1 }
 0x1e3   :  { %976 = vsyncpa [#allocation5 + $0x1], 1 }

</bundles_post_ra>
